<compile_context>
chip_gen: v7x
topology: tpu7x:2x2x1
jax: 0.10.0
libtpu: 0.0.40
codegen_flags: <defaults>
</compile_context>

<pallas_src>
import jax
import jax.numpy as jnp
from jax.experimental import pallas as pl
from jax.experimental.pallas import tpu as pltpu


def lstm_fc_kernel(x_ref,                       # (T*B, D_in)  f32, time-major rows t*B+b
                   wih0_ref, whh0_ref, b0_ref,  # layer 0: (D_in,4H), (H,4H), (1,4H)
                   wih1_ref, whh1_ref, b1_ref,  # layer 1: (H,4H),   (H,4H), (1,4H)
                   wfc_ref, bfc_ref,            # fc: (H,F), (1,F)
                   out_ref):                    # (B, F)
    B = out_ref.shape[0]
    T = x_ref.shape[0] // B
    H = whh0_ref.shape[0]

    # Loop-invariant weight loads / bias broadcast, hoisted out of the recurrence.
    whh0 = whh0_ref[...]
    wih1 = wih1_ref[...]
    whh1 = whh1_ref[...]
    b1 = jnp.broadcast_to(b1_ref[...], (B, 4 * H))

    def cell(gates, c_prev):
        # One full-width sigmoid EUP pass over the (B, 4H) gates vreg slab,
        # one tanh on the g quarter, one tanh on the new cell state.
        sg = jax.nn.sigmoid(gates)
        i = sg[:, 0 * H:1 * H]
        f = sg[:, 1 * H:2 * H]
        o = sg[:, 3 * H:4 * H]
        g = jnp.tanh(gates[:, 2 * H:3 * H])
        c_new = f * c_prev + i * g
        h_new = o * jnp.tanh(c_new)
        return h_new, c_new

    # ---- Pass A: batched layer-0 input projection (one MXU matmul, off-chain) ----
    xp0 = (jnp.dot(x_ref[...], wih0_ref[...], preferred_element_type=jnp.float32)
           + b0_ref[...])                                        # (T*B, 4H)

    # h0/c0/h1/c1 start at zero, matching the reference forward().
    h0 = jnp.zeros((B, H), jnp.float32)
    c0 = jnp.zeros((B, H), jnp.float32)
    h1 = jnp.zeros((B, H), jnp.float32)
    c1 = jnp.zeros((B, H), jnp.float32)

    # ---- Pass B: interleaved two-layer recurrence, fully unrolled ----
    # Layer-0 step t+1 is independent of layer-1 step t, so the LLO scheduler can
    # overlap the two chains inside this single basic block.
    for t in range(T):
        g0 = (xp0[t * B:(t + 1) * B, :]
              + jnp.dot(h0, whh0, preferred_element_type=jnp.float32))
        h0, c0 = cell(g0, c0)

        g1 = (b1
              + jnp.dot(h0, wih1, preferred_element_type=jnp.float32)
              + jnp.dot(h1, whh1, preferred_element_type=jnp.float32))
        h1, c1 = cell(g1, c1)

    # ---- FC on the last timestep's top-layer hidden ----
    out_ref[...] = (jnp.dot(h1, wfc_ref[...], preferred_element_type=jnp.float32)
                    + bfc_ref[...])


def lstm_model_forward(x, params):
    """x: (B, input_size, seq) -> (B, feature_size). All f32."""
    B, D_in, T = x.shape
    F = params["wfc"].shape[1]

    # PyTorch forward: x.permute(0, 2, 1) -> (B, T, D_in).  We flatten to a
    # time-major 2-D slab (rows t*B + b) so the layer-0 input projection is a
    # single lane-dense matmul and the kernel never reshapes.
    x_tm = jnp.transpose(x, (2, 0, 1)).reshape(T * B, D_in).astype(jnp.float32)

    vmem = pl.BlockSpec(memory_space=pltpu.MemorySpace.VMEM)
    # Everything (<100 KiB total) fits comfortably in VMEM, so a single
    # grid-less invocation is the right structure on v5e/v6e/v7x.
    # (At larger batch one would add a batch grid axis with
    #  dimension_semantics=("parallel",) to use v7x's second TensorCore.)
    kernel = pl.pallas_call(
        lstm_fc_kernel,
        out_shape=jax.ShapeDtypeStruct((B, F), jnp.float32),
        in_specs=[vmem] * 9,
        out_specs=vmem,
    )
    return kernel(x_tm,
                  params["wih0"], params["whh0"], params["b0"],
                  params["wih1"], params["whh1"], params["b1"],
                  params["wfc"], params["bfc"])


def make_params(key, input_size, hidden_size, feature_size):
    """Deterministic synthetic parameters (PyTorch-style uniform init).

    Weights are stored pre-transposed for x @ W layouts.
    Per-layer biases b_ih + b_hh are folded into a single (1, 4H) bias.
    """
    H = hidden_size
    k = 1.0 / jnp.sqrt(jnp.float32(H))
    keys = jax.random.split(key, 10)

    def u(k_, shape):
        return jax.random.uniform(k_, shape, jnp.float32, -k, k)

    params = {
        # layer 0
        "wih0": u(keys[0], (input_size, 4 * H)),
        "whh0": u(keys[1], (H, 4 * H)),
        "b0":   u(keys[2], (1, 4 * H)) + u(keys[3], (1, 4 * H)),
        # layer 1
        "wih1": u(keys[4], (H, 4 * H)),
        "whh1": u(keys[5], (H, 4 * H)),
        "b1":   u(keys[6], (1, 4 * H)) + u(keys[7], (1, 4 * H)),
        # fc
        "wfc":  u(keys[8], (H, feature_size)),
        "bfc":  u(keys[9], (1, feature_size)),
    }
    # logit_scale exists in the module but is unused in forward().
    params["logit_scale"] = jnp.log(1.0 / 0.07)
    return params


def lstm_model_reference(x, params):
    """Pure-JAX reference of the same forward pass (for a sanity check)."""
    H = params["whh0"].shape[0]
    x_btd = jnp.transpose(x, (0, 2, 1)).astype(jnp.float32)  # (B, T, D_in)
    B, T, _ = x_btd.shape

    def cell(inp, h, c, wih, whh, b):
        gates = inp @ wih + h @ whh + b
        i = jax.nn.sigmoid(gates[:, 0 * H:1 * H])
        f = jax.nn.sigmoid(gates[:, 1 * H:2 * H])
        g = jnp.tanh(gates[:, 2 * H:3 * H])
        o = jax.nn.sigmoid(gates[:, 3 * H:4 * H])
        c = f * c + i * g
        h = o * jnp.tanh(c)
        return h, c

    h0 = c0 = h1 = c1 = jnp.zeros((B, H), jnp.float32)
    for t in range(T):
        h0, c0 = cell(x_btd[:, t, :], h0, c0,
                      params["wih0"], params["whh0"], params["b0"])
        h1, c1 = cell(h0, h1, c1,
                      params["wih1"], params["whh1"], params["b1"])
    return h1 @ params["wfc"] + params["bfc"]


if __name__ == "__main__":
    # Small shapes consistent with the module's forward:
    #   x: (batch, input_size, seq)
    B, INPUT_SIZE, SEQ = 2, 16, 8
    HIDDEN, FEATURE = 32, 64

    key = jax.random.PRNGKey(0)
    k_x, k_p = jax.random.split(key)
    x = jax.random.normal(k_x, (B, INPUT_SIZE, SEQ), jnp.float32)
    params = make_params(k_p, INPUT_SIZE, HIDDEN, FEATURE)

    out = lstm_model_forward(x, params)
    out = jax.block_until_ready(out)

    ref = lstm_model_reference(x, params)
    assert out.shape == (B, FEATURE)
    assert jnp.allclose(out, ref, atol=1e-4, rtol=1e-4), "mismatch vs reference"

    print("KERNEL_OK")
</pallas_src>

<mosaic_0001>
module attributes {stable_mosaic.version = 11 : i64} {
  func.func @lstm_fc_kernel(%arg0: memref<16x16xf32, #tpu.memory_space<vmem>>, %arg1: memref<16x128xf32, #tpu.memory_space<vmem>>, %arg2: memref<32x128xf32, #tpu.memory_space<vmem>>, %arg3: memref<1x128xf32, #tpu.memory_space<vmem>>, %arg4: memref<32x128xf32, #tpu.memory_space<vmem>>, %arg5: memref<32x128xf32, #tpu.memory_space<vmem>>, %arg6: memref<1x128xf32, #tpu.memory_space<vmem>>, %arg7: memref<32x64xf32, #tpu.memory_space<vmem>>, %arg8: memref<1x64xf32, #tpu.memory_space<vmem>>, %arg9: memref<2x64xf32, #tpu.memory_space<vmem>>) attributes {dimension_semantics = [], scalar_prefetch = 0 : i64, scratch_operands = 0 : i64, tpu.core_type = #tpu.core_type<tc>} {
    %c0 = arith.constant 0 : index
    %c0_0 = arith.constant 0 : index
    %0 = vector.load %arg2[%c0, %c0_0] : memref<32x128xf32, #tpu.memory_space<vmem>>, vector<32x128xf32>
    %c0_1 = arith.constant 0 : index
    %c0_2 = arith.constant 0 : index
    %1 = vector.load %arg4[%c0_1, %c0_2] : memref<32x128xf32, #tpu.memory_space<vmem>>, vector<32x128xf32>
    %c0_3 = arith.constant 0 : index
    %c0_4 = arith.constant 0 : index
    %2 = vector.load %arg5[%c0_3, %c0_4] : memref<32x128xf32, #tpu.memory_space<vmem>>, vector<32x128xf32>
    %c0_5 = arith.constant 0 : index
    %c0_6 = arith.constant 0 : index
    %3 = vector.load %arg6[%c0_5, %c0_6] : memref<1x128xf32, #tpu.memory_space<vmem>>, vector<1x128xf32>
    %4 = vector.shape_cast %3 : vector<1x128xf32> to vector<1x128xf32>
    %5 = vector.broadcast %4 : vector<1x128xf32> to vector<2x128xf32>
    %c0_7 = arith.constant 0 : index
    %c0_8 = arith.constant 0 : index
    %6 = vector.load %arg0[%c0_7, %c0_8] : memref<16x16xf32, #tpu.memory_space<vmem>>, vector<16x16xf32>
    %c0_9 = arith.constant 0 : index
    %c0_10 = arith.constant 0 : index
    %7 = vector.load %arg1[%c0_9, %c0_10] : memref<16x128xf32, #tpu.memory_space<vmem>>, vector<16x128xf32>
    %cst = arith.constant dense<0.000000e+00> : vector<16x128xf32>
    %8 = tpu.matmul %6, %7, %cst {dimension_numbers = #tpu.dot_dimension_numbers<[1], [0], [0], [1], [0, 0, 1, 1], [], []>} : vector<16x16xf32>, vector<16x128xf32>, vector<16x128xf32> -> vector<16x128xf32>
    %c0_11 = arith.constant 0 : index
    %c0_12 = arith.constant 0 : index
    %9 = vector.load %arg3[%c0_11, %c0_12] : memref<1x128xf32, #tpu.memory_space<vmem>>, vector<1x128xf32>
    %10 = vector.broadcast %9 : vector<1x128xf32> to vector<16x128xf32>
    %11 = arith.addf %8, %10 : vector<16x128xf32>
    %cst_13 = arith.constant 0.000000e+00 : f32
    %12 = vector.broadcast %cst_13 : f32 to vector<2x32xf32>
    %cst_14 = arith.constant 0.000000e+00 : f32
    %13 = vector.broadcast %cst_14 : f32 to vector<2x32xf32>
    %cst_15 = arith.constant 0.000000e+00 : f32
    %14 = vector.broadcast %cst_15 : f32 to vector<2x32xf32>
    %cst_16 = arith.constant 0.000000e+00 : f32
    %15 = vector.broadcast %cst_16 : f32 to vector<2x32xf32>
    %16 = vector.extract_strided_slice %11 {offsets = [0, 0], sizes = [2, 128], strides = [1, 1]} : vector<16x128xf32> to vector<2x128xf32>
    %cst_17 = arith.constant dense<0.000000e+00> : vector<2x128xf32>
    %17 = tpu.matmul %12, %0, %cst_17 {dimension_numbers = #tpu.dot_dimension_numbers<[1], [0], [0], [1], [0, 0, 1, 1], [], []>} : vector<2x32xf32>, vector<32x128xf32>, vector<2x128xf32> -> vector<2x128xf32>
    %18 = arith.addf %16, %17 : vector<2x128xf32>
    %19 = arith.negf %18 : vector<2x128xf32>
    %20 = math.exp %19 : vector<2x128xf32>
    %cst_18 = arith.constant 1.000000e+00 : f32
    %21 = vector.broadcast %cst_18 : f32 to vector<2x128xf32>
    %22 = arith.addf %21, %20 : vector<2x128xf32>
    %23 = arith.divf %21, %22 : vector<2x128xf32>
    %24 = vector.extract_strided_slice %23 {offsets = [0, 0], sizes = [2, 32], strides = [1, 1]} : vector<2x128xf32> to vector<2x32xf32>
    %25 = vector.extract_strided_slice %23 {offsets = [0, 32], sizes = [2, 32], strides = [1, 1]} : vector<2x128xf32> to vector<2x32xf32>
    %26 = vector.extract_strided_slice %23 {offsets = [0, 96], sizes = [2, 32], strides = [1, 1]} : vector<2x128xf32> to vector<2x32xf32>
    %27 = vector.extract_strided_slice %18 {offsets = [0, 64], sizes = [2, 32], strides = [1, 1]} : vector<2x128xf32> to vector<2x32xf32>
    %28 = math.tanh %27 : vector<2x32xf32>
    %29 = arith.mulf %25, %13 : vector<2x32xf32>
    %30 = arith.mulf %24, %28 : vector<2x32xf32>
    %31 = arith.addf %29, %30 : vector<2x32xf32>
    %32 = math.tanh %31 : vector<2x32xf32>
    %33 = arith.mulf %26, %32 : vector<2x32xf32>
    %cst_19 = arith.constant dense<0.000000e+00> : vector<2x128xf32>
    %34 = tpu.matmul %33, %1, %cst_19 {dimension_numbers = #tpu.dot_dimension_numbers<[1], [0], [0], [1], [0, 0, 1, 1], [], []>} : vector<2x32xf32>, vector<32x128xf32>, vector<2x128xf32> -> vector<2x128xf32>
    %35 = arith.addf %5, %34 : vector<2x128xf32>
    %cst_20 = arith.constant dense<0.000000e+00> : vector<2x128xf32>
    %36 = tpu.matmul %14, %2, %cst_20 {dimension_numbers = #tpu.dot_dimension_numbers<[1], [0], [0], [1], [0, 0, 1, 1], [], []>} : vector<2x32xf32>, vector<32x128xf32>, vector<2x128xf32> -> vector<2x128xf32>
    %37 = arith.addf %35, %36 : vector<2x128xf32>
    %38 = arith.negf %37 : vector<2x128xf32>
    %39 = math.exp %38 : vector<2x128xf32>
    %cst_21 = arith.constant 1.000000e+00 : f32
    %40 = vector.broadcast %cst_21 : f32 to vector<2x128xf32>
    %41 = arith.addf %40, %39 : vector<2x128xf32>
    %42 = arith.divf %40, %41 : vector<2x128xf32>
    %43 = vector.extract_strided_slice %42 {offsets = [0, 0], sizes = [2, 32], strides = [1, 1]} : vector<2x128xf32> to vector<2x32xf32>
    %44 = vector.extract_strided_slice %42 {offsets = [0, 32], sizes = [2, 32], strides = [1, 1]} : vector<2x128xf32> to vector<2x32xf32>
    %45 = vector.extract_strided_slice %42 {offsets = [0, 96], sizes = [2, 32], strides = [1, 1]} : vector<2x128xf32> to vector<2x32xf32>
    %46 = vector.extract_strided_slice %37 {offsets = [0, 64], sizes = [2, 32], strides = [1, 1]} : vector<2x128xf32> to vector<2x32xf32>
    %47 = math.tanh %46 : vector<2x32xf32>
    %48 = arith.mulf %44, %15 : vector<2x32xf32>
    %49 = arith.mulf %43, %47 : vector<2x32xf32>
    %50 = arith.addf %48, %49 : vector<2x32xf32>
    %51 = math.tanh %50 : vector<2x32xf32>
    %52 = arith.mulf %45, %51 : vector<2x32xf32>
    %53 = vector.extract_strided_slice %11 {offsets = [2, 0], sizes = [2, 128], strides = [1, 1]} : vector<16x128xf32> to vector<2x128xf32>
    %cst_22 = arith.constant dense<0.000000e+00> : vector<2x128xf32>
    %54 = tpu.matmul %33, %0, %cst_22 {dimension_numbers = #tpu.dot_dimension_numbers<[1], [0], [0], [1], [0, 0, 1, 1], [], []>} : vector<2x32xf32>, vector<32x128xf32>, vector<2x128xf32> -> vector<2x128xf32>
    %55 = arith.addf %53, %54 : vector<2x128xf32>
    %56 = arith.negf %55 : vector<2x128xf32>
    %57 = math.exp %56 : vector<2x128xf32>
    %cst_23 = arith.constant 1.000000e+00 : f32
    %58 = vector.broadcast %cst_23 : f32 to vector<2x128xf32>
    %59 = arith.addf %58, %57 : vector<2x128xf32>
    %60 = arith.divf %58, %59 : vector<2x128xf32>
    %61 = vector.extract_strided_slice %60 {offsets = [0, 0], sizes = [2, 32], strides = [1, 1]} : vector<2x128xf32> to vector<2x32xf32>
    %62 = vector.extract_strided_slice %60 {offsets = [0, 32], sizes = [2, 32], strides = [1, 1]} : vector<2x128xf32> to vector<2x32xf32>
    %63 = vector.extract_strided_slice %60 {offsets = [0, 96], sizes = [2, 32], strides = [1, 1]} : vector<2x128xf32> to vector<2x32xf32>
    %64 = vector.extract_strided_slice %55 {offsets = [0, 64], sizes = [2, 32], strides = [1, 1]} : vector<2x128xf32> to vector<2x32xf32>
    %65 = math.tanh %64 : vector<2x32xf32>
    %66 = arith.mulf %62, %31 : vector<2x32xf32>
    %67 = arith.mulf %61, %65 : vector<2x32xf32>
    %68 = arith.addf %66, %67 : vector<2x32xf32>
    %69 = math.tanh %68 : vector<2x32xf32>
    %70 = arith.mulf %63, %69 : vector<2x32xf32>
    %cst_24 = arith.constant dense<0.000000e+00> : vector<2x128xf32>
    %71 = tpu.matmul %70, %1, %cst_24 {dimension_numbers = #tpu.dot_dimension_numbers<[1], [0], [0], [1], [0, 0, 1, 1], [], []>} : vector<2x32xf32>, vector<32x128xf32>, vector<2x128xf32> -> vector<2x128xf32>
    %72 = arith.addf %5, %71 : vector<2x128xf32>
    %cst_25 = arith.constant dense<0.000000e+00> : vector<2x128xf32>
    %73 = tpu.matmul %52, %2, %cst_25 {dimension_numbers = #tpu.dot_dimension_numbers<[1], [0], [0], [1], [0, 0, 1, 1], [], []>} : vector<2x32xf32>, vector<32x128xf32>, vector<2x128xf32> -> vector<2x128xf32>
    %74 = arith.addf %72, %73 : vector<2x128xf32>
    %75 = arith.negf %74 : vector<2x128xf32>
    %76 = math.exp %75 : vector<2x128xf32>
    %cst_26 = arith.constant 1.000000e+00 : f32
    %77 = vector.broadcast %cst_26 : f32 to vector<2x128xf32>
    %78 = arith.addf %77, %76 : vector<2x128xf32>
    %79 = arith.divf %77, %78 : vector<2x128xf32>
    %80 = vector.extract_strided_slice %79 {offsets = [0, 0], sizes = [2, 32], strides = [1, 1]} : vector<2x128xf32> to vector<2x32xf32>
    %81 = vector.extract_strided_slice %79 {offsets = [0, 32], sizes = [2, 32], strides = [1, 1]} : vector<2x128xf32> to vector<2x32xf32>
    %82 = vector.extract_strided_slice %79 {offsets = [0, 96], sizes = [2, 32], strides = [1, 1]} : vector<2x128xf32> to vector<2x32xf32>
    %83 = vector.extract_strided_slice %74 {offsets = [0, 64], sizes = [2, 32], strides = [1, 1]} : vector<2x128xf32> to vector<2x32xf32>
    %84 = math.tanh %83 : vector<2x32xf32>
    %85 = arith.mulf %81, %50 : vector<2x32xf32>
    %86 = arith.mulf %80, %84 : vector<2x32xf32>
    %87 = arith.addf %85, %86 : vector<2x32xf32>
    %88 = math.tanh %87 : vector<2x32xf32>
    %89 = arith.mulf %82, %88 : vector<2x32xf32>
    %90 = vector.extract_strided_slice %11 {offsets = [4, 0], sizes = [2, 128], strides = [1, 1]} : vector<16x128xf32> to vector<2x128xf32>
    %cst_27 = arith.constant dense<0.000000e+00> : vector<2x128xf32>
    %91 = tpu.matmul %70, %0, %cst_27 {dimension_numbers = #tpu.dot_dimension_numbers<[1], [0], [0], [1], [0, 0, 1, 1], [], []>} : vector<2x32xf32>, vector<32x128xf32>, vector<2x128xf32> -> vector<2x128xf32>
    %92 = arith.addf %90, %91 : vector<2x128xf32>
    %93 = arith.negf %92 : vector<2x128xf32>
    %94 = math.exp %93 : vector<2x128xf32>
    %cst_28 = arith.constant 1.000000e+00 : f32
    %95 = vector.broadcast %cst_28 : f32 to vector<2x128xf32>
    %96 = arith.addf %95, %94 : vector<2x128xf32>
    %97 = arith.divf %95, %96 : vector<2x128xf32>
    %98 = vector.extract_strided_slice %97 {offsets = [0, 0], sizes = [2, 32], strides = [1, 1]} : vector<2x128xf32> to vector<2x32xf32>
    %99 = vector.extract_strided_slice %97 {offsets = [0, 32], sizes = [2, 32], strides = [1, 1]} : vector<2x128xf32> to vector<2x32xf32>
    %100 = vector.extract_strided_slice %97 {offsets = [0, 96], sizes = [2, 32], strides = [1, 1]} : vector<2x128xf32> to vector<2x32xf32>
    %101 = vector.extract_strided_slice %92 {offsets = [0, 64], sizes = [2, 32], strides = [1, 1]} : vector<2x128xf32> to vector<2x32xf32>
    %102 = math.tanh %101 : vector<2x32xf32>
    %103 = arith.mulf %99, %68 : vector<2x32xf32>
    %104 = arith.mulf %98, %102 : vector<2x32xf32>
    %105 = arith.addf %103, %104 : vector<2x32xf32>
    %106 = math.tanh %105 : vector<2x32xf32>
    %107 = arith.mulf %100, %106 : vector<2x32xf32>
    %cst_29 = arith.constant dense<0.000000e+00> : vector<2x128xf32>
    %108 = tpu.matmul %107, %1, %cst_29 {dimension_numbers = #tpu.dot_dimension_numbers<[1], [0], [0], [1], [0, 0, 1, 1], [], []>} : vector<2x32xf32>, vector<32x128xf32>, vector<2x128xf32> -> vector<2x128xf32>
    %109 = arith.addf %5, %108 : vector<2x128xf32>
    %cst_30 = arith.constant dense<0.000000e+00> : vector<2x128xf32>
    %110 = tpu.matmul %89, %2, %cst_30 {dimension_numbers = #tpu.dot_dimension_numbers<[1], [0], [0], [1], [0, 0, 1, 1], [], []>} : vector<2x32xf32>, vector<32x128xf32>, vector<2x128xf32> -> vector<2x128xf32>
    %111 = arith.addf %109, %110 : vector<2x128xf32>
    %112 = arith.negf %111 : vector<2x128xf32>
    %113 = math.exp %112 : vector<2x128xf32>
    %cst_31 = arith.constant 1.000000e+00 : f32
    %114 = vector.broadcast %cst_31 : f32 to vector<2x128xf32>
    %115 = arith.addf %114, %113 : vector<2x128xf32>
    %116 = arith.divf %114, %115 : vector<2x128xf32>
    %117 = vector.extract_strided_slice %116 {offsets = [0, 0], sizes = [2, 32], strides = [1, 1]} : vector<2x128xf32> to vector<2x32xf32>
    %118 = vector.extract_strided_slice %116 {offsets = [0, 32], sizes = [2, 32], strides = [1, 1]} : vector<2x128xf32> to vector<2x32xf32>
    %119 = vector.extract_strided_slice %116 {offsets = [0, 96], sizes = [2, 32], strides = [1, 1]} : vector<2x128xf32> to vector<2x32xf32>
    %120 = vector.extract_strided_slice %111 {offsets = [0, 64], sizes = [2, 32], strides = [1, 1]} : vector<2x128xf32> to vector<2x32xf32>
    %121 = math.tanh %120 : vector<2x32xf32>
    %122 = arith.mulf %118, %87 : vector<2x32xf32>
    %123 = arith.mulf %117, %121 : vector<2x32xf32>
    %124 = arith.addf %122, %123 : vector<2x32xf32>
    %125 = math.tanh %124 : vector<2x32xf32>
    %126 = arith.mulf %119, %125 : vector<2x32xf32>
    %127 = vector.extract_strided_slice %11 {offsets = [6, 0], sizes = [2, 128], strides = [1, 1]} : vector<16x128xf32> to vector<2x128xf32>
    %cst_32 = arith.constant dense<0.000000e+00> : vector<2x128xf32>
    %128 = tpu.matmul %107, %0, %cst_32 {dimension_numbers = #tpu.dot_dimension_numbers<[1], [0], [0], [1], [0, 0, 1, 1], [], []>} : vector<2x32xf32>, vector<32x128xf32>, vector<2x128xf32> -> vector<2x128xf32>
    %129 = arith.addf %127, %128 : vector<2x128xf32>
    %130 = arith.negf %129 : vector<2x128xf32>
    %131 = math.exp %130 : vector<2x128xf32>
    %cst_33 = arith.constant 1.000000e+00 : f32
    %132 = vector.broadcast %cst_33 : f32 to vector<2x128xf32>
    %133 = arith.addf %132, %131 : vector<2x128xf32>
    %134 = arith.divf %132, %133 : vector<2x128xf32>
    %135 = vector.extract_strided_slice %134 {offsets = [0, 0], sizes = [2, 32], strides = [1, 1]} : vector<2x128xf32> to vector<2x32xf32>
    %136 = vector.extract_strided_slice %134 {offsets = [0, 32], sizes = [2, 32], strides = [1, 1]} : vector<2x128xf32> to vector<2x32xf32>
    %137 = vector.extract_strided_slice %134 {offsets = [0, 96], sizes = [2, 32], strides = [1, 1]} : vector<2x128xf32> to vector<2x32xf32>
    %138 = vector.extract_strided_slice %129 {offsets = [0, 64], sizes = [2, 32], strides = [1, 1]} : vector<2x128xf32> to vector<2x32xf32>
    %139 = math.tanh %138 : vector<2x32xf32>
    %140 = arith.mulf %136, %105 : vector<2x32xf32>
    %141 = arith.mulf %135, %139 : vector<2x32xf32>
    %142 = arith.addf %140, %141 : vector<2x32xf32>
    %143 = math.tanh %142 : vector<2x32xf32>
    %144 = arith.mulf %137, %143 : vector<2x32xf32>
    %cst_34 = arith.constant dense<0.000000e+00> : vector<2x128xf32>
    %145 = tpu.matmul %144, %1, %cst_34 {dimension_numbers = #tpu.dot_dimension_numbers<[1], [0], [0], [1], [0, 0, 1, 1], [], []>} : vector<2x32xf32>, vector<32x128xf32>, vector<2x128xf32> -> vector<2x128xf32>
    %146 = arith.addf %5, %145 : vector<2x128xf32>
    %cst_35 = arith.constant dense<0.000000e+00> : vector<2x128xf32>
    %147 = tpu.matmul %126, %2, %cst_35 {dimension_numbers = #tpu.dot_dimension_numbers<[1], [0], [0], [1], [0, 0, 1, 1], [], []>} : vector<2x32xf32>, vector<32x128xf32>, vector<2x128xf32> -> vector<2x128xf32>
    %148 = arith.addf %146, %147 : vector<2x128xf32>
    %149 = arith.negf %148 : vector<2x128xf32>
    %150 = math.exp %149 : vector<2x128xf32>
    %cst_36 = arith.constant 1.000000e+00 : f32
    %151 = vector.broadcast %cst_36 : f32 to vector<2x128xf32>
    %152 = arith.addf %151, %150 : vector<2x128xf32>
    %153 = arith.divf %151, %152 : vector<2x128xf32>
    %154 = vector.extract_strided_slice %153 {offsets = [0, 0], sizes = [2, 32], strides = [1, 1]} : vector<2x128xf32> to vector<2x32xf32>
    %155 = vector.extract_strided_slice %153 {offsets = [0, 32], sizes = [2, 32], strides = [1, 1]} : vector<2x128xf32> to vector<2x32xf32>
    %156 = vector.extract_strided_slice %153 {offsets = [0, 96], sizes = [2, 32], strides = [1, 1]} : vector<2x128xf32> to vector<2x32xf32>
    %157 = vector.extract_strided_slice %148 {offsets = [0, 64], sizes = [2, 32], strides = [1, 1]} : vector<2x128xf32> to vector<2x32xf32>
    %158 = math.tanh %157 : vector<2x32xf32>
    %159 = arith.mulf %155, %124 : vector<2x32xf32>
    %160 = arith.mulf %154, %158 : vector<2x32xf32>
    %161 = arith.addf %159, %160 : vector<2x32xf32>
    %162 = math.tanh %161 : vector<2x32xf32>
    %163 = arith.mulf %156, %162 : vector<2x32xf32>
    %164 = vector.extract_strided_slice %11 {offsets = [8, 0], sizes = [2, 128], strides = [1, 1]} : vector<16x128xf32> to vector<2x128xf32>
    %cst_37 = arith.constant dense<0.000000e+00> : vector<2x128xf32>
    %165 = tpu.matmul %144, %0, %cst_37 {dimension_numbers = #tpu.dot_dimension_numbers<[1], [0], [0], [1], [0, 0, 1, 1], [], []>} : vector<2x32xf32>, vector<32x128xf32>, vector<2x128xf32> -> vector<2x128xf32>
    %166 = arith.addf %164, %165 : vector<2x128xf32>
    %167 = arith.negf %166 : vector<2x128xf32>
    %168 = math.exp %167 : vector<2x128xf32>
    %cst_38 = arith.constant 1.000000e+00 : f32
    %169 = vector.broadcast %cst_38 : f32 to vector<2x128xf32>
    %170 = arith.addf %169, %168 : vector<2x128xf32>
    %171 = arith.divf %169, %170 : vector<2x128xf32>
    %172 = vector.extract_strided_slice %171 {offsets = [0, 0], sizes = [2, 32], strides = [1, 1]} : vector<2x128xf32> to vector<2x32xf32>
    %173 = vector.extract_strided_slice %171 {offsets = [0, 32], sizes = [2, 32], strides = [1, 1]} : vector<2x128xf32> to vector<2x32xf32>
    %174 = vector.extract_strided_slice %171 {offsets = [0, 96], sizes = [2, 32], strides = [1, 1]} : vector<2x128xf32> to vector<2x32xf32>
    %175 = vector.extract_strided_slice %166 {offsets = [0, 64], sizes = [2, 32], strides = [1, 1]} : vector<2x128xf32> to vector<2x32xf32>
    %176 = math.tanh %175 : vector<2x32xf32>
    %177 = arith.mulf %173, %142 : vector<2x32xf32>
    %178 = arith.mulf %172, %176 : vector<2x32xf32>
    %179 = arith.addf %177, %178 : vector<2x32xf32>
    %180 = math.tanh %179 : vector<2x32xf32>
    %181 = arith.mulf %174, %180 : vector<2x32xf32>
    %cst_39 = arith.constant dense<0.000000e+00> : vector<2x128xf32>
    %182 = tpu.matmul %181, %1, %cst_39 {dimension_numbers = #tpu.dot_dimension_numbers<[1], [0], [0], [1], [0, 0, 1, 1], [], []>} : vector<2x32xf32>, vector<32x128xf32>, vector<2x128xf32> -> vector<2x128xf32>
    %183 = arith.addf %5, %182 : vector<2x128xf32>
    %cst_40 = arith.constant dense<0.000000e+00> : vector<2x128xf32>
    %184 = tpu.matmul %163, %2, %cst_40 {dimension_numbers = #tpu.dot_dimension_numbers<[1], [0], [0], [1], [0, 0, 1, 1], [], []>} : vector<2x32xf32>, vector<32x128xf32>, vector<2x128xf32> -> vector<2x128xf32>
    %185 = arith.addf %183, %184 : vector<2x128xf32>
    %186 = arith.negf %185 : vector<2x128xf32>
    %187 = math.exp %186 : vector<2x128xf32>
    %cst_41 = arith.constant 1.000000e+00 : f32
    %188 = vector.broadcast %cst_41 : f32 to vector<2x128xf32>
    %189 = arith.addf %188, %187 : vector<2x128xf32>
    %190 = arith.divf %188, %189 : vector<2x128xf32>
    %191 = vector.extract_strided_slice %190 {offsets = [0, 0], sizes = [2, 32], strides = [1, 1]} : vector<2x128xf32> to vector<2x32xf32>
    %192 = vector.extract_strided_slice %190 {offsets = [0, 32], sizes = [2, 32], strides = [1, 1]} : vector<2x128xf32> to vector<2x32xf32>
    %193 = vector.extract_strided_slice %190 {offsets = [0, 96], sizes = [2, 32], strides = [1, 1]} : vector<2x128xf32> to vector<2x32xf32>
    %194 = vector.extract_strided_slice %185 {offsets = [0, 64], sizes = [2, 32], strides = [1, 1]} : vector<2x128xf32> to vector<2x32xf32>
    %195 = math.tanh %194 : vector<2x32xf32>
    %196 = arith.mulf %192, %161 : vector<2x32xf32>
    %197 = arith.mulf %191, %195 : vector<2x32xf32>
    %198 = arith.addf %196, %197 : vector<2x32xf32>
    %199 = math.tanh %198 : vector<2x32xf32>
    %200 = arith.mulf %193, %199 : vector<2x32xf32>
    %201 = vector.extract_strided_slice %11 {offsets = [10, 0], sizes = [2, 128], strides = [1, 1]} : vector<16x128xf32> to vector<2x128xf32>
    %cst_42 = arith.constant dense<0.000000e+00> : vector<2x128xf32>
    %202 = tpu.matmul %181, %0, %cst_42 {dimension_numbers = #tpu.dot_dimension_numbers<[1], [0], [0], [1], [0, 0, 1, 1], [], []>} : vector<2x32xf32>, vector<32x128xf32>, vector<2x128xf32> -> vector<2x128xf32>
    %203 = arith.addf %201, %202 : vector<2x128xf32>
    %204 = arith.negf %203 : vector<2x128xf32>
    %205 = math.exp %204 : vector<2x128xf32>
    %cst_43 = arith.constant 1.000000e+00 : f32
    %206 = vector.broadcast %cst_43 : f32 to vector<2x128xf32>
    %207 = arith.addf %206, %205 : vector<2x128xf32>
    %208 = arith.divf %206, %207 : vector<2x128xf32>
    %209 = vector.extract_strided_slice %208 {offsets = [0, 0], sizes = [2, 32], strides = [1, 1]} : vector<2x128xf32> to vector<2x32xf32>
    %210 = vector.extract_strided_slice %208 {offsets = [0, 32], sizes = [2, 32], strides = [1, 1]} : vector<2x128xf32> to vector<2x32xf32>
    %211 = vector.extract_strided_slice %208 {offsets = [0, 96], sizes = [2, 32], strides = [1, 1]} : vector<2x128xf32> to vector<2x32xf32>
    %212 = vector.extract_strided_slice %203 {offsets = [0, 64], sizes = [2, 32], strides = [1, 1]} : vector<2x128xf32> to vector<2x32xf32>
    %213 = math.tanh %212 : vector<2x32xf32>
    %214 = arith.mulf %210, %179 : vector<2x32xf32>
    %215 = arith.mulf %209, %213 : vector<2x32xf32>
    %216 = arith.addf %214, %215 : vector<2x32xf32>
    %217 = math.tanh %216 : vector<2x32xf32>
    %218 = arith.mulf %211, %217 : vector<2x32xf32>
    %cst_44 = arith.constant dense<0.000000e+00> : vector<2x128xf32>
    %219 = tpu.matmul %218, %1, %cst_44 {dimension_numbers = #tpu.dot_dimension_numbers<[1], [0], [0], [1], [0, 0, 1, 1], [], []>} : vector<2x32xf32>, vector<32x128xf32>, vector<2x128xf32> -> vector<2x128xf32>
    %220 = arith.addf %5, %219 : vector<2x128xf32>
    %cst_45 = arith.constant dense<0.000000e+00> : vector<2x128xf32>
    %221 = tpu.matmul %200, %2, %cst_45 {dimension_numbers = #tpu.dot_dimension_numbers<[1], [0], [0], [1], [0, 0, 1, 1], [], []>} : vector<2x32xf32>, vector<32x128xf32>, vector<2x128xf32> -> vector<2x128xf32>
    %222 = arith.addf %220, %221 : vector<2x128xf32>
    %223 = arith.negf %222 : vector<2x128xf32>
    %224 = math.exp %223 : vector<2x128xf32>
    %cst_46 = arith.constant 1.000000e+00 : f32
    %225 = vector.broadcast %cst_46 : f32 to vector<2x128xf32>
    %226 = arith.addf %225, %224 : vector<2x128xf32>
    %227 = arith.divf %225, %226 : vector<2x128xf32>
    %228 = vector.extract_strided_slice %227 {offsets = [0, 0], sizes = [2, 32], strides = [1, 1]} : vector<2x128xf32> to vector<2x32xf32>
    %229 = vector.extract_strided_slice %227 {offsets = [0, 32], sizes = [2, 32], strides = [1, 1]} : vector<2x128xf32> to vector<2x32xf32>
    %230 = vector.extract_strided_slice %227 {offsets = [0, 96], sizes = [2, 32], strides = [1, 1]} : vector<2x128xf32> to vector<2x32xf32>
    %231 = vector.extract_strided_slice %222 {offsets = [0, 64], sizes = [2, 32], strides = [1, 1]} : vector<2x128xf32> to vector<2x32xf32>
    %232 = math.tanh %231 : vector<2x32xf32>
    %233 = arith.mulf %229, %198 : vector<2x32xf32>
    %234 = arith.mulf %228, %232 : vector<2x32xf32>
    %235 = arith.addf %233, %234 : vector<2x32xf32>
    %236 = math.tanh %235 : vector<2x32xf32>
    %237 = arith.mulf %230, %236 : vector<2x32xf32>
    %238 = vector.extract_strided_slice %11 {offsets = [12, 0], sizes = [2, 128], strides = [1, 1]} : vector<16x128xf32> to vector<2x128xf32>
    %cst_47 = arith.constant dense<0.000000e+00> : vector<2x128xf32>
    %239 = tpu.matmul %218, %0, %cst_47 {dimension_numbers = #tpu.dot_dimension_numbers<[1], [0], [0], [1], [0, 0, 1, 1], [], []>} : vector<2x32xf32>, vector<32x128xf32>, vector<2x128xf32> -> vector<2x128xf32>
    %240 = arith.addf %238, %239 : vector<2x128xf32>
    %241 = arith.negf %240 : vector<2x128xf32>
    %242 = math.exp %241 : vector<2x128xf32>
    %cst_48 = arith.constant 1.000000e+00 : f32
    %243 = vector.broadcast %cst_48 : f32 to vector<2x128xf32>
    %244 = arith.addf %243, %242 : vector<2x128xf32>
    %245 = arith.divf %243, %244 : vector<2x128xf32>
    %246 = vector.extract_strided_slice %245 {offsets = [0, 0], sizes = [2, 32], strides = [1, 1]} : vector<2x128xf32> to vector<2x32xf32>
    %247 = vector.extract_strided_slice %245 {offsets = [0, 32], sizes = [2, 32], strides = [1, 1]} : vector<2x128xf32> to vector<2x32xf32>
    %248 = vector.extract_strided_slice %245 {offsets = [0, 96], sizes = [2, 32], strides = [1, 1]} : vector<2x128xf32> to vector<2x32xf32>
    %249 = vector.extract_strided_slice %240 {offsets = [0, 64], sizes = [2, 32], strides = [1, 1]} : vector<2x128xf32> to vector<2x32xf32>
    %250 = math.tanh %249 : vector<2x32xf32>
    %251 = arith.mulf %247, %216 : vector<2x32xf32>
    %252 = arith.mulf %246, %250 : vector<2x32xf32>
    %253 = arith.addf %251, %252 : vector<2x32xf32>
    %254 = math.tanh %253 : vector<2x32xf32>
    %255 = arith.mulf %248, %254 : vector<2x32xf32>
    %cst_49 = arith.constant dense<0.000000e+00> : vector<2x128xf32>
    %256 = tpu.matmul %255, %1, %cst_49 {dimension_numbers = #tpu.dot_dimension_numbers<[1], [0], [0], [1], [0, 0, 1, 1], [], []>} : vector<2x32xf32>, vector<32x128xf32>, vector<2x128xf32> -> vector<2x128xf32>
    %257 = arith.addf %5, %256 : vector<2x128xf32>
    %cst_50 = arith.constant dense<0.000000e+00> : vector<2x128xf32>
    %258 = tpu.matmul %237, %2, %cst_50 {dimension_numbers = #tpu.dot_dimension_numbers<[1], [0], [0], [1], [0, 0, 1, 1], [], []>} : vector<2x32xf32>, vector<32x128xf32>, vector<2x128xf32> -> vector<2x128xf32>
    %259 = arith.addf %257, %258 : vector<2x128xf32>
    %260 = arith.negf %259 : vector<2x128xf32>
    %261 = math.exp %260 : vector<2x128xf32>
    %cst_51 = arith.constant 1.000000e+00 : f32
    %262 = vector.broadcast %cst_51 : f32 to vector<2x128xf32>
    %263 = arith.addf %262, %261 : vector<2x128xf32>
    %264 = arith.divf %262, %263 : vector<2x128xf32>
    %265 = vector.extract_strided_slice %264 {offsets = [0, 0], sizes = [2, 32], strides = [1, 1]} : vector<2x128xf32> to vector<2x32xf32>
    %266 = vector.extract_strided_slice %264 {offsets = [0, 32], sizes = [2, 32], strides = [1, 1]} : vector<2x128xf32> to vector<2x32xf32>
    %267 = vector.extract_strided_slice %264 {offsets = [0, 96], sizes = [2, 32], strides = [1, 1]} : vector<2x128xf32> to vector<2x32xf32>
    %268 = vector.extract_strided_slice %259 {offsets = [0, 64], sizes = [2, 32], strides = [1, 1]} : vector<2x128xf32> to vector<2x32xf32>
    %269 = math.tanh %268 : vector<2x32xf32>
    %270 = arith.mulf %266, %235 : vector<2x32xf32>
    %271 = arith.mulf %265, %269 : vector<2x32xf32>
    %272 = arith.addf %270, %271 : vector<2x32xf32>
    %273 = math.tanh %272 : vector<2x32xf32>
    %274 = arith.mulf %267, %273 : vector<2x32xf32>
    %275 = vector.extract_strided_slice %11 {offsets = [14, 0], sizes = [2, 128], strides = [1, 1]} : vector<16x128xf32> to vector<2x128xf32>
    %cst_52 = arith.constant dense<0.000000e+00> : vector<2x128xf32>
    %276 = tpu.matmul %255, %0, %cst_52 {dimension_numbers = #tpu.dot_dimension_numbers<[1], [0], [0], [1], [0, 0, 1, 1], [], []>} : vector<2x32xf32>, vector<32x128xf32>, vector<2x128xf32> -> vector<2x128xf32>
    %277 = arith.addf %275, %276 : vector<2x128xf32>
    %278 = arith.negf %277 : vector<2x128xf32>
    %279 = math.exp %278 : vector<2x128xf32>
    %cst_53 = arith.constant 1.000000e+00 : f32
    %280 = vector.broadcast %cst_53 : f32 to vector<2x128xf32>
    %281 = arith.addf %280, %279 : vector<2x128xf32>
    %282 = arith.divf %280, %281 : vector<2x128xf32>
    %283 = vector.extract_strided_slice %282 {offsets = [0, 0], sizes = [2, 32], strides = [1, 1]} : vector<2x128xf32> to vector<2x32xf32>
    %284 = vector.extract_strided_slice %282 {offsets = [0, 32], sizes = [2, 32], strides = [1, 1]} : vector<2x128xf32> to vector<2x32xf32>
    %285 = vector.extract_strided_slice %282 {offsets = [0, 96], sizes = [2, 32], strides = [1, 1]} : vector<2x128xf32> to vector<2x32xf32>
    %286 = vector.extract_strided_slice %277 {offsets = [0, 64], sizes = [2, 32], strides = [1, 1]} : vector<2x128xf32> to vector<2x32xf32>
    %287 = math.tanh %286 : vector<2x32xf32>
    %288 = arith.mulf %284, %253 : vector<2x32xf32>
    %289 = arith.mulf %283, %287 : vector<2x32xf32>
    %290 = arith.addf %288, %289 : vector<2x32xf32>
    %291 = math.tanh %290 : vector<2x32xf32>
    %292 = arith.mulf %285, %291 : vector<2x32xf32>
    %cst_54 = arith.constant dense<0.000000e+00> : vector<2x128xf32>
    %293 = tpu.matmul %292, %1, %cst_54 {dimension_numbers = #tpu.dot_dimension_numbers<[1], [0], [0], [1], [0, 0, 1, 1], [], []>} : vector<2x32xf32>, vector<32x128xf32>, vector<2x128xf32> -> vector<2x128xf32>
    %294 = arith.addf %5, %293 : vector<2x128xf32>
    %cst_55 = arith.constant dense<0.000000e+00> : vector<2x128xf32>
    %295 = tpu.matmul %274, %2, %cst_55 {dimension_numbers = #tpu.dot_dimension_numbers<[1], [0], [0], [1], [0, 0, 1, 1], [], []>} : vector<2x32xf32>, vector<32x128xf32>, vector<2x128xf32> -> vector<2x128xf32>
    %296 = arith.addf %294, %295 : vector<2x128xf32>
    %297 = arith.negf %296 : vector<2x128xf32>
    %298 = math.exp %297 : vector<2x128xf32>
    %cst_56 = arith.constant 1.000000e+00 : f32
    %299 = vector.broadcast %cst_56 : f32 to vector<2x128xf32>
    %300 = arith.addf %299, %298 : vector<2x128xf32>
    %301 = arith.divf %299, %300 : vector<2x128xf32>
    %302 = vector.extract_strided_slice %301 {offsets = [0, 0], sizes = [2, 32], strides = [1, 1]} : vector<2x128xf32> to vector<2x32xf32>
    %303 = vector.extract_strided_slice %301 {offsets = [0, 32], sizes = [2, 32], strides = [1, 1]} : vector<2x128xf32> to vector<2x32xf32>
    %304 = vector.extract_strided_slice %301 {offsets = [0, 96], sizes = [2, 32], strides = [1, 1]} : vector<2x128xf32> to vector<2x32xf32>
    %305 = vector.extract_strided_slice %296 {offsets = [0, 64], sizes = [2, 32], strides = [1, 1]} : vector<2x128xf32> to vector<2x32xf32>
    %306 = math.tanh %305 : vector<2x32xf32>
    %307 = arith.mulf %303, %272 : vector<2x32xf32>
    %308 = arith.mulf %302, %306 : vector<2x32xf32>
    %309 = arith.addf %307, %308 : vector<2x32xf32>
    %310 = math.tanh %309 : vector<2x32xf32>
    %311 = arith.mulf %304, %310 : vector<2x32xf32>
    %c0_57 = arith.constant 0 : index
    %c0_58 = arith.constant 0 : index
    %312 = vector.load %arg7[%c0_57, %c0_58] : memref<32x64xf32, #tpu.memory_space<vmem>>, vector<32x64xf32>
    %cst_59 = arith.constant dense<0.000000e+00> : vector<2x64xf32>
    %313 = tpu.matmul %311, %312, %cst_59 {dimension_numbers = #tpu.dot_dimension_numbers<[1], [0], [0], [1], [0, 0, 1, 1], [], []>} : vector<2x32xf32>, vector<32x64xf32>, vector<2x64xf32> -> vector<2x64xf32>
    %c0_60 = arith.constant 0 : index
    %c0_61 = arith.constant 0 : index
    %314 = vector.load %arg8[%c0_60, %c0_61] : memref<1x64xf32, #tpu.memory_space<vmem>>, vector<1x64xf32>
    %315 = vector.broadcast %314 : vector<1x64xf32> to vector<2x64xf32>
    %316 = arith.addf %313, %315 : vector<2x64xf32>
    %c0_62 = arith.constant 0 : index
    %c0_63 = arith.constant 0 : index
    %317 = vector.load %arg9[%c0_62, %c0_63] : memref<2x64xf32, #tpu.memory_space<vmem>>, vector<2x64xf32>
    tpu.vector_store %arg9[%c0_62, %c0_63], %316 {strides = array<i32>} : memref<2x64xf32, #tpu.memory_space<vmem>>, vector<2x64xf32>,
    return
  }
}

</mosaic_0001>

<bundles_post_ra>
// kernel: tpu_custom_call.1
= control target key start
LH: loop header
LB: loop body
LE: loop exit
PB: predicated region body
PF: predicated region fallthrough
CT: control target
= control target key end

     0   :  { %14 = vsyncpa [#allocation3], 0  ;;  %s4005_s0 = inlined_call_operand.hbm [shape: f32[16,16], index: 0, kind: input, shape index: {}]   ;;  %s4006_s1 = inlined_call_operand.hbm [shape: f32[16,128], index: 1, kind: input, shape index: {}]   ;;  %s4007_s2 = inlined_call_operand.hbm [shape: f32[32,128], index: 2, kind: input, shape index: {}]   ;;  %s4008_s3 = inlined_call_operand.vmem [shape: f32[1,128], index: 3, kind: input, shape index: {}]   ;;  %s4009_s4 = inlined_call_operand.hbm [shape: f32[32,128], index: 4, kind: input, shape index: {}]   ;;  %s4010_s5 = inlined_call_operand.hbm [shape: f32[32,128], index: 5, kind: input, shape index: {}]   ;;  %s4011_s6 = inlined_call_operand.vmem [shape: f32[1,128], index: 6, kind: input, shape index: {}]   ;;  %s4012_s7 = inlined_call_operand.hbm [shape: f32[32,64], index: 7, kind: input, shape index: {}]   ;;  %s4013_s8 = inlined_call_operand.vmem [shape: f32[1,64], index: 8, kind: input, shape index: {}]   ;;  %s4014_s9 = inlined_call_operand.hbm [shape: f32[2,64], index: 9, kind: output, shape index: {}]  }
   0x1   :  { %15 = vsyncpa [#allocation6], 0 }
   0x2   :  { %16 = vsyncpa [#allocation9], 0 }
   0x3   :  { %17 = vsyncpa [#allocation12], 0 }
   0x4   :  { %18 = vsyncpa [#allocation4], 0  ;;  %s3484_s30 = smov [#allocation5]   ;;  %s3485_s11 = smov [#allocation8]  }
   0x5   :  { %s36_s10 = sshll.u32 %s3484_s30, 4  ;;  %s62_s12 = sshll.u32 %s3485_s11, 4  ;;  %s37_s10 = int_to_ptr.vmem [resolvable:$true] %s36_s10  ;;  %s3548_s12 = int_to_ptr.vmem [resolvable:$true] %s62_s12 }
   0x6   :  { %s3320_s15 = scalar_lea.hbm %s4006_s1, 256 }
   0x7   :  { %p3321_p0 = scmp.ne.s32.totalorder %s4006_s1, %s3320_s15  ;;  %p3324_p1 = scmp.lt.u32.totalorder %s3320_s15, %s4006_s1 }
   0x9   :  { %p3326_p2 = pnand %p3324_p1, %p3321_p0 }
   0xb   :  { %3329 = shalt.err (!%p3326_p2)
}
   0xc   :  { %s3330_s20 = scalar_lea.vmem %s37_s10, 256  ;;  %p3335_p4 = scmp.lt.s32.totalorder %s37_s10, %s37_s10 }
   0xd   :  { %p3331_p3 = scmp.ne.s32.totalorder %s37_s10, %s3330_s20  ;;  %p3336_p5 = scmp.lt.s32.totalorder %s3330_s20, %s3330_s20 }
   0xf   :  { %p3337_p6 = por %p3336_p5, %p3335_p4 }
  0x11   :  { %p3338_p7 = pnand %p3337_p6, %p3331_p3 }
  0x13   :  { %3341 = shalt.err (!%p3338_p7)
}
  0x14   :  { %s3486_s21 = smov 128   ;;  %s3487_s22 = smov 8  }
  0x15   :  { %42 = dma.hbm_to_vmem [thread:$0]  %s4006_s1, 256, %s37_s10, [#allocation6], %s3486_s21, %s3486_s21, %s3487_s22  }
  0x16   :  { %s3342_s27 = scalar_lea.hbm %s4009_s4, 512 }
  0x17   :  { %p3343_p8 = scmp.ne.s32.totalorder %s4009_s4, %s3342_s27  ;;  %p3346_p9 = scmp.lt.u32.totalorder %s3342_s27, %s4009_s4 }
  0x19   :  { %p3348_p10 = pnand %p3346_p9, %p3343_p8 }
  0x1b   :  { %3351 = shalt.err (!%p3348_p10)
}
  0x1c   :  { %s3352_s13 = scalar_lea.vmem %s3548_s12, 512  ;;  %p3357_p12 = scmp.lt.s32.totalorder %s3548_s12, %s3548_s12 }
  0x1d   :  { %p3353_p11 = scmp.ne.s32.totalorder %s3548_s12, %s3352_s13  ;;  %p3358_p13 = scmp.lt.s32.totalorder %s3352_s13, %s3352_s13 }
  0x1f   :  { %p3359_p0 = por %p3358_p13, %p3357_p12 }
  0x21   :  { %p3360_p1 = pnand %p3359_p0, %p3353_p11 }
  0x23   :  { %3363 = shalt.err (!%p3360_p1)
}
  0x24   :  { %68 = dma.hbm_to_vmem [thread:$0]  %s4009_s4, 512, %s3548_s12, [#allocation9], %s3486_s21, %s3486_s21, %s3487_s22  }
  0x25   :  { %s3488_s14 = smov [#allocation2]   ;;  %s3489_s16 = smov [#allocation7]  }
  0x26   :  { %s24_s15 = sshll.u32 %s3488_s14, 4  ;;  %s48_s17 = sshll.u32 %s3489_s16, 4  ;;  %s25_s15 = int_to_ptr.vmem [resolvable:$true] %s24_s15  ;;  %s3585_s17 = int_to_ptr.vmem [resolvable:$true] %s48_s17 }
  0x27   :  { %s3364_s20 = scalar_lea.hbm %s4005_s0, 256 }
  0x28   :  { %p3365_p2 = scmp.ne.s32.totalorder %s4005_s0, %s3364_s20  ;;  %p3368_p3 = scmp.lt.u32.totalorder %s3364_s20, %s4005_s0 }
  0x2a   :  { %p3370_p4 = pnand %p3368_p3, %p3365_p2 }
  0x2c   :  { %3373 = shalt.err (!%p3370_p4)
}
  0x2d   :  { %s3374_s4 = scalar_lea.vmem %s25_s15, 256  ;;  %p3379_p6 = scmp.lt.s32.totalorder %s25_s15, %s25_s15 }
  0x2e   :  { %p3375_p5 = scmp.ne.s32.totalorder %s25_s15, %s3374_s4  ;;  %p3380_p7 = scmp.lt.s32.totalorder %s3374_s4, %s3374_s4 }
  0x30   :  { %p3381_p8 = por %p3380_p7, %p3379_p6 }
  0x32   :  { %p3382_p9 = pnand %p3381_p8, %p3375_p5 }
  0x34   :  { %3385 = shalt.err (!%p3382_p9)
}
  0x35   :  { %30 = dma.hbm_to_vmem [thread:$0]  %s4005_s0, 256, %s25_s15, [#allocation3], %s3486_s21, %s3486_s21, %s3487_s22  }
  0x36   :  { %s3386_s30 = scalar_lea.hbm %s4007_s2, 512 }
  0x37   :  { %p3387_p10 = scmp.ne.s32.totalorder %s4007_s2, %s3386_s30  ;;  %p3390_p11 = scmp.lt.u32.totalorder %s3386_s30, %s4007_s2 }
  0x39   :  { %p3392_p12 = pnand %p3390_p11, %p3387_p10 }
  0x3b   :  { %3395 = shalt.err (!%p3392_p12)
}
  0x3c   :  { %s3396_s14 = scalar_lea.vmem %s3585_s17, 512  ;;  %p3401_p0 = scmp.lt.s32.totalorder %s3585_s17, %s3585_s17 }
  0x3d   :  { %p3397_p13 = scmp.ne.s32.totalorder %s3585_s17, %s3396_s14  ;;  %p3402_p1 = scmp.lt.s32.totalorder %s3396_s14, %s3396_s14 }
  0x3f   :  { %p3403_p2 = por %p3402_p1, %p3401_p0 }
  0x41   :  { %p3404_p3 = pnand %p3403_p2, %p3397_p13 }
  0x43   :  { %3407 = shalt.err (!%p3404_p3)
}
  0x44   :  { %54 = dma.hbm_to_vmem [thread:$0]  %s4007_s2, 512, %s3585_s17, [#allocation6], %s3486_s21, %s3486_s21, %s3487_s22  }
  0x45   :  { %s3490_s16 = smov [#allocation10]   ;;  %s3491_s19 = smov [#allocation11]  }
  0x46   :  { %s74_s18 = sshll.u32 %s3490_s16, 4  ;;  %s88_s20 = sshll.u32 %s3491_s19, 4  ;;  %s75_s18 = int_to_ptr.vmem [resolvable:$true] %s74_s18  ;;  %s3622_s20 = int_to_ptr.vmem [resolvable:$true] %s88_s20 }
  0x47   :  { %s3408_s25 = scalar_lea.hbm %s4010_s5, 512 }
  0x48   :  { %p3409_p4 = scmp.ne.s32.totalorder %s4010_s5, %s3408_s25  ;;  %p3412_p5 = scmp.lt.u32.totalorder %s3408_s25, %s4010_s5 }
  0x4a   :  { %p3414_p6 = pnand %p3412_p5, %p3409_p4 }
  0x4c   :  { %3417 = shalt.err (!%p3414_p6)
}
  0x4d   :  { %s3418_s2 = scalar_lea.vmem %s75_s18, 512  ;;  %p3423_p8 = scmp.lt.s32.totalorder %s75_s18, %s75_s18 }
  0x4e   :  { %p3419_p7 = scmp.ne.s32.totalorder %s75_s18, %s3418_s2  ;;  %p3424_p9 = scmp.lt.s32.totalorder %s3418_s2, %s3418_s2 }
  0x50   :  { %p3425_p10 = por %p3424_p9, %p3423_p8 }
  0x52   :  { %p3426_p11 = pnand %p3425_p10, %p3419_p7 }
  0x54   :  { %3429 = shalt.err (!%p3426_p11)
}
  0x55   :  { %80 = dma.hbm_to_vmem [thread:$0]  %s4010_s5, 512, %s75_s18, [#allocation9], %s3486_s21, %s3486_s21, %s3487_s22  }
  0x56   :  { %s3430_s11 = scalar_lea.hbm %s4012_s7, 512 }
  0x57   :  { %p3431_p12 = scmp.ne.s32.totalorder %s4012_s7, %s3430_s11  ;;  %p3434_p13 = scmp.lt.u32.totalorder %s3430_s11, %s4012_s7 }
  0x59   :  { %p3436_p0 = pnand %p3434_p13, %p3431_p12 }
  0x5b   :  { %3439 = shalt.err (!%p3436_p0)
}
  0x5c   :  { %s3440_s0 = scalar_lea.vmem %s3622_s20, 512  ;;  %p3445_p2 = scmp.lt.s32.totalorder %s3622_s20, %s3622_s20 }
  0x5d   :  { %p3441_p1 = scmp.ne.s32.totalorder %s3622_s20, %s3440_s0  ;;  %p3446_p3 = scmp.lt.s32.totalorder %s3440_s0, %s3440_s0 }
  0x5f   :  { %p3447_p4 = por %p3446_p3, %p3445_p2 }
  0x61   :  { %p3448_p5 = pnand %p3447_p4, %p3441_p1 }
  0x63   :  { %3451 = shalt.err (!%p3448_p5)
}
  0x64   :  { %94 = dma.hbm_to_vmem [thread:$0]  %s4012_s7, 512, %s3622_s20, [#allocation12], %s3486_s21, %s3486_s21, %s3487_s22  }
  0x65   :  { %3474 = dma.done.wait [#allocation3], 256  }
  0x66   :  { %3475 = vsyncadd [#allocation3], 4294967040 }
  0x67   :  { %3476 = dma.done.wait [#allocation6], 768  }
  0x68   :  { %3477 = vsyncadd [#allocation6], 4294966528 }
  0x69   :  { %3478 = dma.done.wait [#allocation9], 1024  }
  0x6a   :  { %3479 = vsyncadd [#allocation9], 4294966272 }
  0x6b   :  { %3480 = dma.done.wait [#allocation12], 512  }
  0x6c   :  { %3481 = vsyncadd [#allocation12], 4294966784  ;;  %v3492_v0 = vmov 0.0|0.0   ;;  %vm3493_vm0 = vmmov 0   ;;  %v3494_v1 = vmov 0.0   ;;  %vm145_vm1 = vcmask 130048  }
  0x6d   :  { %3004 = vmatprep.subr.bf16.mxu1 %v3492_v0  ;;  %2733 = vmatprep.mubr.msk.f32.mxu1 %vm3493_vm0, %v3494_v1  ;;  %v136_v2 = vld [vmem:[#allocation5] sm:$0xff]  ;;  %v137_v3 = vld [vmem:[#allocation5 + $0x8] sm:$0xff]  ;;  %v115_v4 = vld [vmem:[#allocation7] sm:$0xff]  ;;  %s3495_s22 = smov 64   ;;  %vm227_vm2 = vcmask 261120   ;;  %s3497_s20 = smov [#allocation13]  }
  0x6e   :  { %v3000_v5 = vpack.c.bf16 %v137_v3, %v136_v2  ;;  %v116_v6 = vld [vmem:[#allocation7 + $0x8] sm:$0xff]  ;;  %v134_v7 = vld [vmem:[#allocation2] sm:$0xff]  ;;  %v117_v9 = vld [vmem:[#allocation7 + $0x10] sm:$0xff]  ;;  %s2533_s23 = sshll.u32 %s3497_s20, 4  ;;  %vm2525_vm3 = vcmask 517120   ;;  %s2534_s23 = int_to_ptr.vmem [resolvable:$true] %s2533_s23 }
  0x6f   :  { %v3662_v8 = vpack.c.bf16 %v116_v6, %v115_v4  ;;  %2722 = vmatprep.mubr.msk.f32.mxu0 %vm145_vm1, %v134_v7  ;;  %v118_v10 = vld [vmem:[#allocation7 + $0x18] sm:$0xff]  ;;  %v135_v11 = vld [vmem:[#allocation2 + $0x8] sm:$0xff]  ;;  %v2546_v13 = vld [vmem:[%s4008_s3] ss:$0 sm:$0xff]  ;;  %s3496_s3 = smov 32   ;;  %s3452_s24 = scalar_lea.vmem %s2534_s23, 32 }
  0x70   :  { %3001 = vmatprep.subr.bf16.mxu0 %v3000_v5  ;;  %v3666_v12 = vpack.c.bf16 %v118_v10, %v117_v9  ;;  %v119_v31 = vld [vmem:[#allocation8] sm:$0xff]  ;;  %v120_v32 = vld [vmem:[#allocation8 + $0x8] sm:$0xff]  ;;  %v121_v33 = vld [vmem:[#allocation8 + $0x10] sm:$0xff]  ;;  %p3453_p6 = scmp.ne.s32.totalorder %s2534_s23, %s3452_s24  ;;  %p3457_p7 = scmp.lt.s32.totalorder %s2534_s23, %s2534_s23 }
  0x71   :  { %3006 = vmatpush3.bf16.msra.mxu1 %v3662_v8  ;;  %3003 = vmatpush3.bf16.msra.mxu0 %v3000_v5  ;;  %v3695_v34 = vpack.c.bf16 %v120_v32, %v119_v31  ;;  %v122_v35 = vld [vmem:[#allocation8 + $0x18] sm:$0xff]  ;;  %v123_v40 = vld [vmem:[#allocation10] sm:$0xff]  ;;  %v124_v41 = vld [vmem:[#allocation10 + $0x8] sm:$0xff]  ;;  %p3458_p8 = scmp.lt.s32.totalorder %s3452_s24, %s3452_s24 }
  0x72   :  { %3007 = vmatprep.subr.bf16.mxu1 %v3492_v0  ;;  %3010 = vmatprep.subr.bf16.mxu0 %v3492_v0  ;;  %v3698_v36 = vpack.c.bf16 %v122_v35, %v121_v33  ;;  %v3705_v42 = vpack.c.bf16 %v124_v41, %v123_v40  ;;  %v125_v43 = vld [vmem:[#allocation10 + $0x10] sm:$0xff]  ;;  %v126_v44 = vld [vmem:[#allocation10 + $0x18] sm:$0xff]  ;;  %v3734_v51 = vld [vmem:[%s4011_s6] ss:$0 sm:$0xff] }
  0x73   :  { %v3710_v46 = vpack.c.bf16 %v126_v44, %v125_v43  ;;  %p3459_p9 = por %p3458_p8, %p3457_p7 }
  0x74   :  { %2723 = vmatmul.mubr.msk.f32.vlgmr.msra.gmra.mrb[0].mxu0 %vm145_vm1, %v135_v11 }
  0x75   :  { %3009 = vmatpush3.bf16.msra.mxu1 %v3666_v12  ;;  %2744 = vmatprep.mubr.msk.f32.mxu0 %vm3493_vm0, %v3494_v1  ;;  %p3460_p10 = pnand %p3459_p9, %p3453_p6 }
  0x76   :  { %3022 = vmatprep.subr.bf16.mxu1 %v3492_v0  ;;  %3012 = vmatpush3.bf16.msra.mxu0 %v3695_v34 }
  0x77   :  { %3013 = vmatprep.subr.bf16.mxu0 %v3492_v0 }
  0x78   :  { %2734 = vmatmul.mubr.f32.vlgmr.msra.gmra.mrb[0].mxu1 %v3494_v1 }
  0x79   :  { %3024 = vmatpush3.bf16.msra.mxu1 %v3662_v8  ;;  %2766 = vmatprep.mubr.msk.f32.mxu1 %vm3493_vm0, %v3494_v1 }
  0x7a   :  { %3025 = vmatprep.subr.bf16.mxu1 %v3492_v0  ;;  %3015 = vmatpush3.bf16.msra.mxu0 %v3698_v36 }
  0x7b   :  { %3016 = vmatprep.subr.bf16.mxu0 %v3492_v0 }
  0x7d   :  { %3027 = vmatpush3.bf16.msra.mxu1 %v3666_v12 }
  0x7e   :  { %3028 = vmatprep.subr.bf16.mxu1 %v3492_v0 }
 0x147   :  { %v2724_v14 = vpop.f32.mrb[0].mxu0 }
 0x148   :  { %v3685_v15 = vadd.f32 %v2724_v14, %v2546_v13  ;;  %v218_v16 = vpop.f32.mrb[1].mxu0 }
 0x149   :  { %v3687_v17 = vadd.f32 %v2546_v13, %v218_v16 }
 0x14b   :  { %v297_v18 = vpop.f32.mrb[0].mxu1 }
 0x14c   :  { %v301_v19 = vadd.f32 %v297_v18, %v3687_v17  ;;  %v2735_v20 = vpop.f32.mrb[1].mxu1 }
 0x14e   :  { %3192 = vtanh.f32 %v301_v19  ;;  %v2549_v22 = vmul.f32 -1.442695, %v301_v19 }
 0x150   :  { %3194 = vpow2.f32 %v2549_v22 }
 0x158   :  { %v3193_v21 = vpop.eup %3192 }
 0x159   :  { %311 = vrot.lane.b32.xlu0 %v3193_v21, %s3495_s22 }
 0x15a   :  { %v3195_v23 = vpop.eup %3194 }
 0x15b   :  { %v305_v24 = vadd.f32 1.0, %v3195_v23 }
 0x15d   :  { %3196 = vrcp.f32 %v305_v24 }
 0x167   :  { %v3197_v25 = vpop.eup %3196 }
 0x168   :  { %v309_v28 = vmul.f32 0.0, %v3197_v25 }
 0x1cb   :  { %v312_v26 = vpop.permute.xlu0 %311 }
 0x1cc   :  { %v314_v27 = vmul.f32 %v3197_v25, %v312_v26 }
 0x1ce   :  { %316 = vrot.lane.b32.xlu0 %v314_v27, %s3496_s3 }
 0x240   :  { %v317_v29 = vpop.permute.xlu0 %316 }
 0x241   :  { %v3692_v30 = vadd.f32 %v317_v29, %v309_v28 }
 0x243   :  { %3198 = vtanh.f32 %v3692_v30  ;;  %v579_v7 = vrot.slane %v3692_v30, 6 }
 0x24d   :  { %v3199_v37 = vpop.eup %3198 }
 0x24e   :  { %322 = vrot.lane.b32.xlu1 %v3199_v37, %s3495_s22 }
 0x2c0   :  { %v323_v38 = vpop.permute.xlu1 %322 }
 0x2c1   :  { %v325_v39 = vmul.f32 %v3197_v25, %v323_v38 }
 0x2c3   :  { %327 = vrot.lane.b32.xlu1 %v325_v39, %s3496_s3 }
 0x335   :  { %v328_v45 = vpop.permute.xlu1 %327 }
 0x336   :  { %2745 = vmatmul.mubr.msk.f32.vlgmr.msra.gmra.mrb[2].mxu0 %vm227_vm2, %v328_v45  ;;  %2767 = vmatmul.mubr.msk.f32.vlgmr.msra.gmra.mrb[2].mxu1 %vm227_vm2, %v328_v45 }
 0x337   :  { %3018 = vmatpush3.bf16.msra.mxu0 %v3705_v42  ;;  %2755 = vmatprep.mubr.msk.f32.mxu0 %vm3493_vm0, %v3494_v1 }
 0x338   :  { %3019 = vmatprep.subr.bf16.mxu0 %v3492_v0  ;;  %3030 = vmatpush3.bf16.msra.mxu1 %v3695_v34 }
 0x339   :  { %3031 = vmatprep.subr.bf16.mxu1 %v3492_v0  ;;  %2777 = vmatprep.mubr.msk.f32.mxu1 %vm3493_vm0, %v3494_v1 }
 0x33b   :  { %3021 = vmatpush3.bf16.msra.mxu0 %v3710_v46 }
 0x33c   :  { %3040 = vmatprep.subr.bf16.mxu0 %v3492_v0  ;;  %3033 = vmatpush3.bf16.msra.mxu1 %v3698_v36 }
 0x33d   :  { %3034 = vmatprep.subr.bf16.mxu1 %v3492_v0 }
 0x33e   :  { %2756 = vmatmul.mubr.f32.vlgmr.msra.gmra.mrb[2].mxu0 %v3494_v1 }
 0x33f   :  { %3042 = vmatpush3.bf16.msra.mxu0 %v3662_v8  ;;  %2799 = vmatprep.mubr.msk.f32.mxu0 %vm3493_vm0, %v3494_v1 }
 0x340   :  { %3043 = vmatprep.subr.bf16.mxu0 %v3492_v0 }
 0x343   :  { %3045 = vmatpush3.bf16.msra.mxu0 %v3666_v12 }
 0x344   :  { %3046 = vmatprep.subr.bf16.mxu0 %v3492_v0 }
 0x409   :  { %v563_v47 = vpop.f32.mrb[2].mxu1 }
 0x40a   :  { %v568_v48 = vrot.slane %v563_v47, 6  ;;  %v2768_v49 = vpop.f32.mrb[3].mxu1 }
 0x40c   :  { %v570_v50 = vadd.f32 %v568_v48, %v3687_v17 }
 0x40e   :  { %3200 = vtanh.f32 %v570_v50  ;;  %v2553_v57 = vmul.f32 -1.442695, %v570_v50 }
 0x411   :  { %v468_v52 = vpop.f32.mrb[2].mxu0 }
 0x412   :  { %v3154_v53 = vadd.f32 %v3734_v51, %v468_v52  ;;  %v2757_v54 = vpop.f32.mrb[3].mxu0 }
 0x414   :  { %3202 = vtanh.f32 %v3154_v53  ;;  %v2551_v58 = vmul.f32 -1.442695, %v3154_v53 }
 0x415   :  { %3204 = vpow2.f32 %v2553_v57 }
 0x416   :  { %3206 = vpow2.f32 %v2551_v58 }
 0x418   :  { %v3201_v55 = vpop.eup %3200 }
 0x419   :  { %583 = vrot.lane.b32.xlu0 %v3201_v55, %s3495_s22 }
 0x41e   :  { %v3203_v56 = vpop.eup %3202 }
 0x41f   :  { %482 = vrot.lane.b32.xlu1 %v3203_v56, %s3495_s22  ;;  %v3205_v59 = vpop.eup %3204 }
 0x420   :  { %v574_v60 = vadd.f32 1.0, %v3205_v59  ;;  %v3207_v61 = vpop.eup %3206 }
 0x421   :  { %v476_v62 = vadd.f32 1.0, %v3207_v61 }
 0x422   :  { %3208 = vrcp.f32 %v574_v60 }
 0x423   :  { %3210 = vrcp.f32 %v476_v62 }
 0x42c   :  { %v3209_v63 = vpop.eup %3208 }
 0x42d   :  { %v3211_v4 = vpop.eup %3210  ;;  %v581_v9 = vmul.f32 %v3209_v63, %v579_v7 }
 0x42e   :  { %v480_v13 = vmul.f32 0.0, %v3211_v4 }
 0x48b   :  { %v584_v2 = vpop.permute.xlu0 %583 }
 0x48c   :  { %v586_v3 = vmul.f32 %v3209_v63, %v584_v2 }
 0x48e   :  { %588 = vrot.lane.b32.xlu0 %v586_v3, %s3496_s3 }
 0x491   :  { %v483_v5 = vpop.permute.xlu1 %482 }
 0x492   :  { %v485_v6 = vmul.f32 %v3211_v4, %v483_v5 }
 0x494   :  { %487 = vrot.lane.b32.xlu1 %v485_v6, %s3496_s3 }
 0x500   :  { %v589_v10 = vpop.permute.xlu0 %588 }
 0x501   :  { %v3742_v11 = vadd.f32 %v589_v10, %v581_v9 }
 0x503   :  { %3212 = vtanh.f32 %v3742_v11  ;;  %v857_v53 = vrot.slane %v3742_v11, 6 }
 0x506   :  { %v488_v14 = vpop.permute.xlu1 %487 }
 0x507   :  { %v3745_v16 = vadd.f32 %v488_v14, %v480_v13 }
 0x509   :  { %3214 = vtanh.f32 %v3745_v16 }
 0x50d   :  { %v3213_v18 = vpop.eup %3212 }
 0x50e   :  { %594 = vrot.lane.b32.xlu0 %v3213_v18, %s3495_s22 }
 0x513   :  { %v3215_v19 = vpop.eup %3214 }
 0x514   :  { %493 = vrot.lane.b32.xlu1 %v3215_v19, %s3495_s22 }
 0x580   :  { %v595_v20 = vpop.permute.xlu0 %594 }
 0x581   :  { %v597_v21 = vmul.f32 %v3209_v63, %v595_v20 }
 0x583   :  { %v599_v22 = vrot.slane %v597_v21, 2 }
 0x585   :  { %600 = vrot.lane.b32.xlu0 %v599_v22, %s3496_s3 }
 0x586   :  { %v494_v23 = vpop.permute.xlu1 %493 }
 0x587   :  { %v496_v24 = vmul.f32 %v3211_v4, %v494_v23 }
 0x589   :  { %676 = vrot.lane.b32.xlu1 %v496_v24, %s3496_s3 }
 0x5f7   :  { %v601_v25 = vpop.permute.xlu0 %600 }
 0x5f8   :  { %2778 = vmatmul.mubr.msk.f32.vlgmr.msra.gmra.mrb[4].mxu1 %vm227_vm2, %v601_v25  ;;  %2800 = vmatmul.mubr.msk.f32.vlgmr.msra.gmra.mrb[4].mxu0 %vm227_vm2, %v601_v25 }
 0x5f9   :  { %3036 = vmatpush3.bf16.msra.mxu1 %v3705_v42  ;;  %2788 = vmatprep.mubr.msk.f32.mxu1 %vm3493_vm0, %v3494_v1 }
 0x5fa   :  { %3037 = vmatprep.subr.bf16.mxu1 %v3492_v0  ;;  %3048 = vmatpush3.bf16.msra.mxu0 %v3695_v34 }
 0x5fb   :  { %3049 = vmatprep.subr.bf16.mxu0 %v3492_v0  ;;  %2810 = vmatprep.mubr.msk.f32.mxu0 %vm3493_vm0, %v3494_v1  ;;  %v677_v26 = vpop.permute.xlu1 %676 }
 0x5fd   :  { %3039 = vmatpush3.bf16.msra.mxu1 %v3710_v46 }
 0x5fe   :  { %3058 = vmatprep.subr.bf16.mxu1 %v3492_v0  ;;  %3051 = vmatpush3.bf16.msra.mxu0 %v3698_v36 }
 0x5ff   :  { %3052 = vmatprep.subr.bf16.mxu0 %v3492_v0 }
 0x600   :  { %2789 = vmatmul.mubr.msk.f32.vlgmr.msra.gmra.mrb[4].mxu1 %vm227_vm2, %v677_v26 }
 0x601   :  { %3060 = vmatpush3.bf16.msra.mxu1 %v3662_v8  ;;  %2832 = vmatprep.mubr.msk.f32.mxu1 %vm3493_vm0, %v3494_v1 }
 0x602   :  { %3061 = vmatprep.subr.bf16.mxu1 %v3492_v0 }
 0x605   :  { %3063 = vmatpush3.bf16.msra.mxu1 %v3666_v12 }
 0x606   :  { %3064 = vmatprep.subr.bf16.mxu1 %v3492_v0 }
 0x6cb   :  { %v841_v27 = vpop.f32.mrb[4].mxu0 }
 0x6cc   :  { %v846_v28 = vrot.slane %v841_v27, 4  ;;  %v2801_v29 = vpop.f32.mrb[5].mxu0 }
 0x6ce   :  { %v848_v30 = vadd.f32 %v846_v28, %v3687_v17 }
 0x6d0   :  { %3216 = vtanh.f32 %v848_v30  ;;  %v2558_v38 = vmul.f32 -1.442695, %v848_v30 }
 0x6d3   :  { %v746_v31 = vpop.f32.mrb[4].mxu1 }
 0x6d4   :  { %v3155_v32 = vadd.f32 %v3734_v51, %v746_v31  ;;  %v2790_v33 = vpop.f32.mrb[5].mxu1 }
 0x6d6   :  { %3218 = vtanh.f32 %v3155_v32  ;;  %v2556_v39 = vmul.f32 -1.442695, %v3155_v32 }
 0x6d7   :  { %3220 = vpow2.f32 %v2558_v38 }
 0x6d8   :  { %3222 = vpow2.f32 %v2556_v39 }
 0x6da   :  { %v3217_v35 = vpop.eup %3216 }
 0x6db   :  { %861 = vrot.lane.b32.xlu0 %v3217_v35, %s3495_s22 }
 0x6e0   :  { %v3219_v37 = vpop.eup %3218 }
 0x6e1   :  { %760 = vrot.lane.b32.xlu1 %v3219_v37, %s3495_s22  ;;  %v3221_v40 = vpop.eup %3220 }
 0x6e2   :  { %v852_v41 = vadd.f32 1.0, %v3221_v40  ;;  %v3223_v43 = vpop.eup %3222 }
 0x6e3   :  { %v754_v44 = vadd.f32 1.0, %v3223_v43 }
 0x6e4   :  { %3224 = vrcp.f32 %v852_v41 }
 0x6e5   :  { %3226 = vrcp.f32 %v754_v44 }
 0x6ee   :  { %v3225_v45 = vpop.eup %3224 }
 0x6ef   :  { %v3227_v49 = vpop.eup %3226  ;;  %v859_v54 = vmul.f32 %v3225_v45, %v857_v53 }
 0x6f0   :  { %v758_v57 = vmul.f32 %v3227_v49, %v3745_v16 }
 0x74d   :  { %v862_v47 = vpop.permute.xlu0 %861 }
 0x74e   :  { %v864_v48 = vmul.f32 %v3225_v45, %v862_v47 }
 0x750   :  { %866 = vrot.lane.b32.xlu0 %v864_v48, %s3496_s3 }
 0x753   :  { %v761_v50 = vpop.permute.xlu1 %760 }
 0x754   :  { %v763_v52 = vmul.f32 %v3227_v49, %v761_v50 }
 0x756   :  { %765 = vrot.lane.b32.xlu1 %v763_v52, %s3496_s3 }
 0x7c2   :  { %v867_v55 = vpop.permute.xlu0 %866 }
 0x7c3   :  { %v3780_v56 = vadd.f32 %v867_v55, %v859_v54 }
 0x7c5   :  { %3228 = vtanh.f32 %v3780_v56  ;;  %v1135_v31 = vrot.slane %v3780_v56, 6 }
 0x7c8   :  { %v766_v58 = vpop.permute.xlu1 %765 }
 0x7c9   :  { %v3784_v59 = vadd.f32 %v766_v58, %v758_v57 }
 0x7cb   :  { %3230 = vtanh.f32 %v3784_v59 }
 0x7cf   :  { %v3229_v60 = vpop.eup %3228 }
 0x7d0   :  { %872 = vrot.lane.b32.xlu0 %v3229_v60, %s3495_s22 }
 0x7d5   :  { %v3231_v61 = vpop.eup %3230 }
 0x7d6   :  { %771 = vrot.lane.b32.xlu1 %v3231_v61, %s3495_s22 }
 0x842   :  { %v873_v62 = vpop.permute.xlu0 %872 }
 0x843   :  { %v875_v63 = vmul.f32 %v3225_v45, %v873_v62 }
 0x845   :  { %v877_v2 = vrot.slane %v875_v63, 4 }
 0x847   :  { %878 = vrot.lane.b32.xlu0 %v877_v2, %s3496_s3 }
 0x848   :  { %v772_v3 = vpop.permute.xlu1 %771 }
 0x849   :  { %v774_v4 = vmul.f32 %v3227_v49, %v772_v3 }
 0x84b   :  { %954 = vrot.lane.b32.xlu1 %v774_v4, %s3496_s3 }
 0x8b9   :  { %v879_v5 = vpop.permute.xlu0 %878 }
 0x8ba   :  { %2811 = vmatmul.mubr.msk.f32.vlgmr.msra.gmra.mrb[6].mxu0 %vm227_vm2, %v879_v5  ;;  %2833 = vmatmul.mubr.msk.f32.vlgmr.msra.gmra.mrb[6].mxu1 %vm227_vm2, %v879_v5 }
 0x8bb   :  { %3054 = vmatpush3.bf16.msra.mxu0 %v3705_v42  ;;  %2821 = vmatprep.mubr.msk.f32.mxu0 %vm3493_vm0, %v3494_v1 }
 0x8bc   :  { %3055 = vmatprep.subr.bf16.mxu0 %v3492_v0  ;;  %3066 = vmatpush3.bf16.msra.mxu1 %v3695_v34 }
 0x8bd   :  { %3067 = vmatprep.subr.bf16.mxu1 %v3492_v0  ;;  %2843 = vmatprep.mubr.msk.f32.mxu1 %vm3493_vm0, %v3494_v1  ;;  %v955_v6 = vpop.permute.xlu1 %954 }
 0x8bf   :  { %3057 = vmatpush3.bf16.msra.mxu0 %v3710_v46 }
 0x8c0   :  { %3076 = vmatprep.subr.bf16.mxu0 %v3492_v0  ;;  %3069 = vmatpush3.bf16.msra.mxu1 %v3698_v36 }
 0x8c1   :  { %3070 = vmatprep.subr.bf16.mxu1 %v3492_v0 }
 0x8c2   :  { %2822 = vmatmul.mubr.msk.f32.vlgmr.msra.gmra.mrb[6].mxu0 %vm227_vm2, %v955_v6 }
 0x8c3   :  { %3078 = vmatpush3.bf16.msra.mxu0 %v3662_v8  ;;  %2865 = vmatprep.mubr.msk.f32.mxu0 %vm3493_vm0, %v3494_v1 }
 0x8c4   :  { %3079 = vmatprep.subr.bf16.mxu0 %v3492_v0 }
 0x8c7   :  { %3081 = vmatpush3.bf16.msra.mxu0 %v3666_v12 }
 0x8c8   :  { %3082 = vmatprep.subr.bf16.mxu0 %v3492_v0 }
 0x98d   :  { %v1119_v7 = vpop.f32.mrb[6].mxu1 }
 0x98e   :  { %v1124_v9 = vrot.slane %v1119_v7, 2  ;;  %v2834_v10 = vpop.f32.mrb[7].mxu1 }
 0x990   :  { %v1126_v11 = vadd.f32 %v1124_v9, %v3687_v17 }
 0x992   :  { %3232 = vtanh.f32 %v1126_v11  ;;  %v2563_v20 = vmul.f32 -1.442695, %v1126_v11 }
 0x995   :  { %v1024_v13 = vpop.f32.mrb[6].mxu0 }
 0x996   :  { %v3156_v14 = vadd.f32 %v3734_v51, %v1024_v13  ;;  %v2823_v16 = vpop.f32.mrb[7].mxu0 }
 0x998   :  { %3234 = vtanh.f32 %v3156_v14  ;;  %v2561_v21 = vmul.f32 -1.442695, %v3156_v14 }
 0x999   :  { %3236 = vpow2.f32 %v2563_v20 }
 0x99a   :  { %3238 = vpow2.f32 %v2561_v21 }
 0x99c   :  { %v3233_v18 = vpop.eup %3232 }
 0x99d   :  { %1139 = vrot.lane.b32.xlu0 %v3233_v18, %s3495_s22 }
 0x9a2   :  { %v3235_v19 = vpop.eup %3234 }
 0x9a3   :  { %1038 = vrot.lane.b32.xlu1 %v3235_v19, %s3495_s22  ;;  %v3237_v22 = vpop.eup %3236 }
 0x9a4   :  { %v1130_v23 = vadd.f32 1.0, %v3237_v22  ;;  %v3239_v24 = vpop.eup %3238 }
 0x9a5   :  { %v1032_v17 = vadd.f32 1.0, %v3239_v24 }
 0x9a6   :  { %3240 = vrcp.f32 %v1130_v23 }
 0x9a7   :  { %3242 = vrcp.f32 %v1032_v17 }
 0x9b0   :  { %v3241_v25 = vpop.eup %3240 }
 0x9b1   :  { %v3243_v28 = vpop.eup %3242  ;;  %v1137_v32 = vmul.f32 %v3241_v25, %v1135_v31 }
 0x9b2   :  { %v1036_v37 = vmul.f32 %v3243_v28, %v3784_v59 }
 0xa0f   :  { %v1140_v26 = vpop.permute.xlu0 %1139 }
 0xa10   :  { %v1142_v27 = vmul.f32 %v3241_v25, %v1140_v26 }
 0xa12   :  { %1144 = vrot.lane.b32.xlu0 %v1142_v27, %s3496_s3 }
 0xa15   :  { %v1039_v29 = vpop.permute.xlu1 %1038 }
 0xa16   :  { %v1041_v30 = vmul.f32 %v3243_v28, %v1039_v29 }
 0xa18   :  { %1043 = vrot.lane.b32.xlu1 %v1041_v30, %s3496_s3 }
 0xa84   :  { %v1145_v33 = vpop.permute.xlu0 %1144 }
 0xa85   :  { %v3819_v35 = vadd.f32 %v1145_v33, %v1137_v32 }
 0xa87   :  { %3244 = vtanh.f32 %v3819_v35  ;;  %v1410_v11 = vrot.slane %v3819_v35, 6 }
 0xa8a   :  { %v1044_v38 = vpop.permute.xlu1 %1043 }
 0xa8b   :  { %v3823_v39 = vadd.f32 %v1044_v38, %v1036_v37 }
 0xa8d   :  { %3246 = vtanh.f32 %v3823_v39 }
 0xa91   :  { %v3245_v40 = vpop.eup %3244 }
 0xa92   :  { %1150 = vrot.lane.b32.xlu0 %v3245_v40, %s3495_s22 }
 0xa97   :  { %v3247_v41 = vpop.eup %3246 }
 0xa98   :  { %1049 = vrot.lane.b32.xlu1 %v3247_v41, %s3495_s22 }
 0xb04   :  { %v1151_v43 = vpop.permute.xlu0 %1150 }
 0xb05   :  { %v1153_v44 = vmul.f32 %v3241_v25, %v1151_v43 }
 0xb07   :  { %v1155_v45 = vrot.slane %v1153_v44, 6 }
 0xb09   :  { %1156 = vrot.lane.b32.xlu0 %v1155_v45, %s3496_s3 }
 0xb0a   :  { %v1050_v47 = vpop.permute.xlu1 %1049 }
 0xb0b   :  { %v1052_v48 = vmul.f32 %v3243_v28, %v1050_v47 }
 0xb0d   :  { %1232 = vrot.lane.b32.xlu1 %v1052_v48, %s3496_s3 }
 0xb7b   :  { %v1157_v49 = vpop.permute.xlu0 %1156 }
 0xb7c   :  { %2844 = vmatmul.mubr.msk.f32.vlgmr.msra.gmra.mrb[8].mxu1 %vm227_vm2, %v1157_v49  ;;  %2866 = vmatmul.mubr.msk.f32.vlgmr.msra.gmra.mrb[8].mxu0 %vm227_vm2, %v1157_v49 }
 0xb7d   :  { %3072 = vmatpush3.bf16.msra.mxu1 %v3705_v42  ;;  %2854 = vmatprep.mubr.msk.f32.mxu1 %vm3493_vm0, %v3494_v1 }
 0xb7e   :  { %3073 = vmatprep.subr.bf16.mxu1 %v3492_v0  ;;  %3084 = vmatpush3.bf16.msra.mxu0 %v3695_v34 }
 0xb7f   :  { %3085 = vmatprep.subr.bf16.mxu0 %v3492_v0  ;;  %2876 = vmatprep.mubr.msk.f32.mxu0 %vm3493_vm0, %v3494_v1  ;;  %v1233_v50 = vpop.permute.xlu1 %1232 }
 0xb81   :  { %3075 = vmatpush3.bf16.msra.mxu1 %v3710_v46 }
 0xb82   :  { %3094 = vmatprep.subr.bf16.mxu1 %v3492_v0  ;;  %3087 = vmatpush3.bf16.msra.mxu0 %v3698_v36 }
 0xb83   :  { %3088 = vmatprep.subr.bf16.mxu0 %v3492_v0 }
 0xb84   :  { %2855 = vmatmul.mubr.msk.f32.vlgmr.msra.gmra.mrb[8].mxu1 %vm227_vm2, %v1233_v50 }
 0xb85   :  { %3096 = vmatpush3.bf16.msra.mxu1 %v3662_v8  ;;  %2898 = vmatprep.mubr.msk.f32.mxu1 %vm3493_vm0, %v3494_v1 }
 0xb86   :  { %3097 = vmatprep.subr.bf16.mxu1 %v3492_v0 }
 0xb89   :  { %3099 = vmatpush3.bf16.msra.mxu1 %v3666_v12 }
 0xb8a   :  { %3100 = vmatprep.subr.bf16.mxu1 %v3492_v0 }
 0xc4f   :  { %v1397_v52 = vpop.f32.mrb[8].mxu0 }
 0xc50   :  { %v1401_v53 = vadd.f32 %v1397_v52, %v3685_v15  ;;  %v2867_v54 = vpop.f32.mrb[9].mxu0 }
 0xc52   :  { %3248 = vtanh.f32 %v1401_v53  ;;  %v2568_v60 = vmul.f32 -1.442695, %v1401_v53 }
 0xc57   :  { %v1302_v55 = vpop.f32.mrb[8].mxu1 }
 0xc58   :  { %v3157_v56 = vadd.f32 %v3734_v51, %v1302_v55  ;;  %v2856_v57 = vpop.f32.mrb[9].mxu1 }
 0xc5a   :  { %3250 = vtanh.f32 %v3157_v56  ;;  %v2566_v61 = vmul.f32 -1.442695, %v3157_v56 }
 0xc5b   :  { %3252 = vpow2.f32 %v2568_v60 }
 0xc5c   :  { %v3249_v58 = vpop.eup %3248  ;;  %3254 = vpow2.f32 %v2566_v61 }
 0xc5d   :  { %1414 = vrot.lane.b32.xlu0 %v3249_v58, %s3495_s22 }
 0xc64   :  { %v3251_v59 = vpop.eup %3250 }
 0xc65   :  { %1316 = vrot.lane.b32.xlu1 %v3251_v59, %s3495_s22  ;;  %v3253_v62 = vpop.eup %3252 }
 0xc66   :  { %v1405_v63 = vadd.f32 1.0, %v3253_v62  ;;  %v3255_v2 = vpop.eup %3254 }
 0xc67   :  { %v1310_v3 = vadd.f32 1.0, %v3255_v2 }
 0xc68   :  { %3256 = vrcp.f32 %v1405_v63 }
 0xc69   :  { %3258 = vrcp.f32 %v1310_v3 }
 0xc72   :  { %v3257_v4 = vpop.eup %3256 }
 0xc73   :  { %v3259_v7 = vpop.eup %3258  ;;  %v1412_v13 = vmul.f32 %v3257_v4, %v1410_v11 }
 0xc74   :  { %v1314_v18 = vmul.f32 %v3259_v7, %v3823_v39 }
 0xccf   :  { %v1415_v5 = vpop.permute.xlu0 %1414 }
 0xcd0   :  { %v1417_v6 = vmul.f32 %v3257_v4, %v1415_v5 }
 0xcd2   :  { %1419 = vrot.lane.b32.xlu0 %v1417_v6, %s3496_s3 }
 0xcd7   :  { %v1317_v9 = vpop.permute.xlu1 %1316 }
 0xcd8   :  { %v1319_v10 = vmul.f32 %v3259_v7, %v1317_v9 }
 0xcda   :  { %1321 = vrot.lane.b32.xlu1 %v1319_v10, %s3496_s3 }
 0xd44   :  { %v1420_v14 = vpop.permute.xlu0 %1419 }
 0xd45   :  { %v3858_v16 = vadd.f32 %v1420_v14, %v1412_v13 }
 0xd47   :  { %3260 = vtanh.f32 %v3858_v16  ;;  %v1687_v54 = vrot.slane %v3858_v16, 6 }
 0xd4c   :  { %v1322_v19 = vpop.permute.xlu1 %1321 }
 0xd4d   :  { %v3862_v20 = vadd.f32 %v1322_v19, %v1314_v18 }
 0xd4f   :  { %3262 = vtanh.f32 %v3862_v20 }
 0xd51   :  { %v3261_v21 = vpop.eup %3260 }
 0xd52   :  { %1425 = vrot.lane.b32.xlu0 %v3261_v21, %s3495_s22 }
 0xd59   :  { %v3263_v22 = vpop.eup %3262 }
 0xd5a   :  { %1327 = vrot.lane.b32.xlu1 %v3263_v22, %s3495_s22 }
 0xdc4   :  { %v1426_v23 = vpop.permute.xlu0 %1425 }
 0xdc5   :  { %v1428_v24 = vmul.f32 %v3257_v4, %v1426_v23 }
 0xdc7   :  { %1430 = vrot.lane.b32.xlu0 %v1428_v24, %s3496_s3 }
 0xdcc   :  { %v1328_v17 = vpop.permute.xlu1 %1327 }
 0xdcd   :  { %v1330_v25 = vmul.f32 %v3259_v7, %v1328_v17 }
 0xdcf   :  { %1506 = vrot.lane.b32.xlu1 %v1330_v25, %s3496_s3 }
 0xe39   :  { %v1431_v26 = vpop.permute.xlu0 %1430 }
 0xe3a   :  { %2877 = vmatmul.mubr.msk.f32.vlgmr.msra.gmra.mrb[10].mxu0 %vm227_vm2, %v1431_v26  ;;  %2899 = vmatmul.mubr.msk.f32.vlgmr.msra.gmra.mrb[10].mxu1 %vm227_vm2, %v1431_v26 }
 0xe3b   :  { %3090 = vmatpush3.bf16.msra.mxu0 %v3705_v42  ;;  %2887 = vmatprep.mubr.msk.f32.mxu0 %vm3493_vm0, %v3494_v1 }
 0xe3c   :  { %3091 = vmatprep.subr.bf16.mxu0 %v3492_v0  ;;  %3102 = vmatpush3.bf16.msra.mxu1 %v3695_v34 }
 0xe3d   :  { %3103 = vmatprep.subr.bf16.mxu1 %v3492_v0  ;;  %2909 = vmatprep.mubr.msk.f32.mxu1 %vm3493_vm0, %v3494_v1 }
 0xe3f   :  { %3093 = vmatpush3.bf16.msra.mxu0 %v3710_v46 }
 0xe40   :  { %3112 = vmatprep.subr.bf16.mxu0 %v3492_v0  ;;  %3105 = vmatpush3.bf16.msra.mxu1 %v3698_v36 }
 0xe41   :  { %v1507_v27 = vpop.permute.xlu1 %1506  ;;  %3106 = vmatprep.subr.bf16.mxu1 %v3492_v0 }
 0xe42   :  { %2888 = vmatmul.mubr.msk.f32.vlgmr.msra.gmra.mrb[10].mxu0 %vm227_vm2, %v1507_v27 }
 0xe43   :  { %3114 = vmatpush3.bf16.msra.mxu0 %v3662_v8  ;;  %2931 = vmatprep.mubr.msk.f32.mxu0 %vm3493_vm0, %v3494_v1 }
 0xe44   :  { %3115 = vmatprep.subr.bf16.mxu0 %v3492_v0 }
 0xe47   :  { %3117 = vmatpush3.bf16.msra.mxu0 %v3666_v12 }
 0xe48   :  { %3118 = vmatprep.subr.bf16.mxu0 %v3492_v0 }
 0xf0d   :  { %v1671_v28 = vpop.f32.mrb[10].mxu1 }
 0xf0e   :  { %v1676_v29 = vrot.slane %v1671_v28, 6  ;;  %v2900_v30 = vpop.f32.mrb[11].mxu1 }
 0xf10   :  { %v1678_v31 = vadd.f32 %v1676_v29, %v3685_v15 }
 0xf12   :  { %3264 = vtanh.f32 %v1678_v31  ;;  %v2573_v39 = vmul.f32 -1.442695, %v1678_v31 }
 0xf15   :  { %v1576_v32 = vpop.f32.mrb[10].mxu0 }
 0xf16   :  { %v3158_v33 = vadd.f32 %v3734_v51, %v1576_v32  ;;  %v2889_v35 = vpop.f32.mrb[11].mxu0 }
 0xf18   :  { %3266 = vtanh.f32 %v3158_v33  ;;  %v2571_v40 = vmul.f32 -1.442695, %v3158_v33 }
 0xf19   :  { %3268 = vpow2.f32 %v2573_v39 }
 0xf1a   :  { %3270 = vpow2.f32 %v2571_v40 }
 0xf1c   :  { %v3265_v37 = vpop.eup %3264 }
 0xf1d   :  { %1691 = vrot.lane.b32.xlu0 %v3265_v37, %s3495_s22 }
 0xf22   :  { %v3267_v38 = vpop.eup %3266 }
 0xf23   :  { %1590 = vrot.lane.b32.xlu1 %v3267_v38, %s3495_s22  ;;  %v3269_v41 = vpop.eup %3268 }
 0xf24   :  { %v1682_v43 = vadd.f32 1.0, %v3269_v41  ;;  %v3271_v44 = vpop.eup %3270 }
 0xf25   :  { %v1584_v45 = vadd.f32 1.0, %v3271_v44 }
 0xf26   :  { %3272 = vrcp.f32 %v1682_v43 }
 0xf27   :  { %3274 = vrcp.f32 %v1584_v45 }
 0xf30   :  { %v3273_v47 = vpop.eup %3272 }
 0xf31   :  { %v3275_v50 = vpop.eup %3274  ;;  %v1689_v55 = vmul.f32 %v3273_v47, %v1687_v54 }
 0xf32   :  { %v1588_v58 = vmul.f32 %v3275_v50, %v3862_v20 }
 0xf8f   :  { %v1692_v48 = vpop.permute.xlu0 %1691 }
 0xf90   :  { %v1694_v49 = vmul.f32 %v3273_v47, %v1692_v48 }
 0xf92   :  { %1696 = vrot.lane.b32.xlu0 %v1694_v49, %s3496_s3 }
 0xf95   :  { %v1591_v52 = vpop.permute.xlu1 %1590 }
 0xf96   :  { %v1593_v53 = vmul.f32 %v3275_v50, %v1591_v52 }
 0xf98   :  { %1595 = vrot.lane.b32.xlu1 %v1593_v53, %s3496_s3 }
0x1004   :  { %v1697_v56 = vpop.permute.xlu0 %1696 }
0x1005   :  { %v3897_v57 = vadd.f32 %v1697_v56, %v1689_v55 }
0x1007   :  { %3276 = vtanh.f32 %v3897_v57  ;;  %v1965_v30 = vrot.slane %v3897_v57, 6 }
0x100a   :  { %v1596_v59 = vpop.permute.xlu1 %1595 }
0x100b   :  { %v3901_v60 = vadd.f32 %v1596_v59, %v1588_v58 }
0x100d   :  { %3278 = vtanh.f32 %v3901_v60 }
0x1011   :  { %v3277_v61 = vpop.eup %3276 }
0x1012   :  { %1702 = vrot.lane.b32.xlu0 %v3277_v61, %s3495_s22 }
0x1017   :  { %v3279_v62 = vpop.eup %3278 }
0x1018   :  { %1601 = vrot.lane.b32.xlu1 %v3279_v62, %s3495_s22 }
0x1084   :  { %v1703_v63 = vpop.permute.xlu0 %1702 }
0x1085   :  { %v1705_v2 = vmul.f32 %v3273_v47, %v1703_v63 }
0x1087   :  { %v1707_v3 = vrot.slane %v1705_v2, 2 }
0x1089   :  { %1708 = vrot.lane.b32.xlu0 %v1707_v3, %s3496_s3 }
0x108a   :  { %v1602_v4 = vpop.permute.xlu1 %1601 }
0x108b   :  { %v1604_v5 = vmul.f32 %v3275_v50, %v1602_v4 }
0x108d   :  { %1784 = vrot.lane.b32.xlu1 %v1604_v5, %s3496_s3 }
0x10fb   :  { %v1709_v6 = vpop.permute.xlu0 %1708 }
0x10fc   :  { %2910 = vmatmul.mubr.msk.f32.vlgmr.msra.gmra.mrb[12].mxu1 %vm227_vm2, %v1709_v6  ;;  %2932 = vmatmul.mubr.msk.f32.vlgmr.msra.gmra.mrb[12].mxu0 %vm227_vm2, %v1709_v6 }
0x10fd   :  { %3108 = vmatpush3.bf16.msra.mxu1 %v3705_v42  ;;  %2920 = vmatprep.mubr.msk.f32.mxu1 %vm3493_vm0, %v3494_v1 }
0x10fe   :  { %3109 = vmatprep.subr.bf16.mxu1 %v3492_v0  ;;  %3120 = vmatpush3.bf16.msra.mxu0 %v3695_v34 }
0x10ff   :  { %3121 = vmatprep.subr.bf16.mxu0 %v3492_v0  ;;  %2942 = vmatprep.mubr.msk.f32.mxu0 %vm3493_vm0, %v3494_v1  ;;  %v1785_v7 = vpop.permute.xlu1 %1784 }
0x1101   :  { %3111 = vmatpush3.bf16.msra.mxu1 %v3710_v46 }
0x1102   :  { %3130 = vmatprep.subr.bf16.mxu1 %v3492_v0  ;;  %3123 = vmatpush3.bf16.msra.mxu0 %v3698_v36 }
0x1103   :  { %3124 = vmatprep.subr.bf16.mxu0 %v3492_v0 }
0x1104   :  { %2921 = vmatmul.mubr.msk.f32.vlgmr.msra.gmra.mrb[12].mxu1 %vm227_vm2, %v1785_v7 }
0x1105   :  { %3132 = vmatpush3.bf16.msra.mxu1 %v3662_v8  ;;  %2964 = vmatprep.mubr.msk.f32.mxu1 %vm3493_vm0, %v3494_v1 }
0x1106   :  { %3133 = vmatprep.subr.bf16.mxu1 %v3492_v0 }
0x1109   :  { %3135 = vmatpush3.bf16.msra.mxu1 %v3666_v12 }
0x110a   :  { %3136 = vmatprep.subr.bf16.mxu1 %v3492_v0 }
0x11cf   :  { %v1949_v9 = vpop.f32.mrb[12].mxu0 }
0x11d0   :  { %v1954_v10 = vrot.slane %v1949_v9, 4  ;;  %v2933_v11 = vpop.f32.mrb[13].mxu0 }
0x11d2   :  { %v1956_v13 = vadd.f32 %v1954_v10, %v3685_v15 }
0x11d4   :  { %3280 = vtanh.f32 %v1956_v13  ;;  %v2578_v12 = vmul.f32 -1.442695, %v1956_v13 }
0x11d7   :  { %v1854_v14 = vpop.f32.mrb[12].mxu1 }
0x11d8   :  { %v3159_v16 = vadd.f32 %v3734_v51, %v1854_v14  ;;  %v2922_v18 = vpop.f32.mrb[13].mxu1 }
0x11da   :  { %3282 = vtanh.f32 %v3159_v16  ;;  %v2576_v20 = vmul.f32 -1.442695, %v3159_v16 }
0x11db   :  { %3284 = vpow2.f32 %v2578_v12 }
0x11dc   :  { %3286 = vpow2.f32 %v2576_v20 }
0x11de   :  { %v3281_v8 = vpop.eup %3280 }
0x11df   :  { %1969 = vrot.lane.b32.xlu0 %v3281_v8, %s3495_s22 }
0x11e4   :  { %v3283_v19 = vpop.eup %3282 }
0x11e5   :  { %1868 = vrot.lane.b32.xlu1 %v3283_v19, %s3495_s22  ;;  %v3285_v21 = vpop.eup %3284 }
0x11e6   :  { %v1960_v22 = vadd.f32 1.0, %v3285_v21  ;;  %v3287_v23 = vpop.eup %3286 }
0x11e7   :  { %v1862_v24 = vadd.f32 1.0, %v3287_v23 }
0x11e8   :  { %3288 = vrcp.f32 %v1960_v22 }
0x11e9   :  { %3290 = vrcp.f32 %v1862_v24 }
0x11f2   :  { %v3289_v17 = vpop.eup %3288 }
0x11f3   :  { %v3291_v27 = vpop.eup %3290  ;;  %v1967_v31 = vmul.f32 %v3289_v17, %v1965_v30 }
0x11f4   :  { %v1866_v35 = vmul.f32 %v3291_v27, %v3901_v60 }
0x1251   :  { %v1970_v25 = vpop.permute.xlu0 %1969 }
0x1252   :  { %v1972_v26 = vmul.f32 %v3289_v17, %v1970_v25 }
0x1254   :  { %1974 = vrot.lane.b32.xlu0 %v1972_v26, %s3496_s3 }
0x1257   :  { %v1869_v28 = vpop.permute.xlu1 %1868 }
0x1258   :  { %v1871_v29 = vmul.f32 %v3291_v27, %v1869_v28 }
0x125a   :  { %1873 = vrot.lane.b32.xlu1 %v1871_v29, %s3496_s3 }
0x12c6   :  { %v1975_v32 = vpop.permute.xlu0 %1974 }
0x12c7   :  { %v3936_v33 = vadd.f32 %v1975_v32, %v1967_v31 }
0x12c9   :  { %3292 = vtanh.f32 %v3936_v33  ;;  %v2243_v7 = vrot.slane %v3936_v33, 6 }
0x12cc   :  { %v1874_v37 = vpop.permute.xlu1 %1873 }
0x12cd   :  { %v3940_v38 = vadd.f32 %v1874_v37, %v1866_v35  ;;  %v2440_v35 = vld [vmem:[#allocation11 + $0x8] sm:$0xff]  ;;  %v2441_v37 = vld [vmem:[#allocation11 + $0x10] sm:$0xff] }
0x12cf   :  { %3294 = vtanh.f32 %v3940_v38 }
0x12d3   :  { %v3293_v39 = vpop.eup %3292 }
0x12d4   :  { %1980 = vrot.lane.b32.xlu0 %v3293_v39, %s3495_s22  ;;  %v2442_v39 = vld [vmem:[#allocation11 + $0x18] sm:$0xff] }
0x12d9   :  { %v3295_v40 = vpop.eup %3294 }
0x12da   :  { %1879 = vrot.lane.b32.xlu1 %v3295_v40, %s3495_s22  ;;  %v3152_v40 = vpack.c.bf16 %v2442_v39, %v2441_v37 }
0x1346   :  { %v1981_v41 = vpop.permute.xlu0 %1980 }
0x1347   :  { %v1983_v43 = vmul.f32 %v3289_v17, %v1981_v41 }
0x1349   :  { %v1985_v44 = vrot.slane %v1983_v43, 4 }
0x134b   :  { %1986 = vrot.lane.b32.xlu0 %v1985_v44, %s3496_s3 }
0x134c   :  { %v1880_v45 = vpop.permute.xlu1 %1879 }
0x134d   :  { %v1882_v47 = vmul.f32 %v3291_v27, %v1880_v45 }
0x134f   :  { %2062 = vrot.lane.b32.xlu1 %v1882_v47, %s3496_s3  ;;  %v2587_v47 = vld [vmem:[%s4013_s8] ss:$0 sm:$0xff] }
0x13bd   :  { %v1987_v48 = vpop.permute.xlu0 %1986 }
0x13be   :  { %2943 = vmatmul.mubr.msk.f32.vlgmr.msra.gmra.mrb[14].mxu0 %vm227_vm2, %v1987_v48  ;;  %2965 = vmatmul.mubr.msk.f32.vlgmr.msra.gmra.mrb[14].mxu1 %vm227_vm2, %v1987_v48 }
0x13bf   :  { %3126 = vmatpush3.bf16.msra.mxu0 %v3705_v42  ;;  %2953 = vmatprep.mubr.msk.f32.mxu0 %vm3493_vm0, %v3494_v1 }
0x13c0   :  { %3127 = vmatprep.subr.bf16.mxu0 %v3492_v0  ;;  %3138 = vmatpush3.bf16.msra.mxu1 %v3695_v34 }
0x13c1   :  { %3139 = vmatprep.subr.bf16.mxu1 %v3492_v0  ;;  %2975 = vmatprep.mubr.msk.f32.mxu1 %vm3493_vm0, %v3494_v1  ;;  %v2063_v49 = vpop.permute.xlu1 %2062 }
0x13c3   :  { %3129 = vmatpush3.bf16.msra.mxu0 %v3710_v46 }
0x13c4   :  { %3141 = vmatpush3.bf16.msra.mxu1 %v3698_v36  ;;  %3148 = vmatprep.subr.bf16.mxu0 %v3492_v0 }
0x13c5   :  { %3142 = vmatprep.subr.bf16.mxu1 %v3492_v0 }
0x13c6   :  { %2954 = vmatmul.mubr.msk.f32.vlgmr.msra.gmra.mrb[14].mxu0 %vm227_vm2, %v2063_v49 }
0x13c7   :  { %2997 = vmatprep.mubr.msk.f32.mxu0 %vm3493_vm0, %v3494_v1 }
0x1491   :  { %v2227_v34 = vpop.f32.mrb[14].mxu1 }
0x1492   :  { %v2232_v50 = vrot.slane %v2227_v34, 2  ;;  %v2966_v52 = vpop.f32.mrb[15].mxu1 }
0x1494   :  { %v2234_v53 = vadd.f32 %v2232_v50, %v3685_v15 }
0x1496   :  { %3296 = vtanh.f32 %v2234_v53  ;;  %v2583_v58 = vmul.f32 -1.442695, %v2234_v53 }
0x1499   :  { %v2132_v54 = vpop.f32.mrb[14].mxu0 }
0x149a   :  { %v3160_v55 = vadd.f32 %v3734_v51, %v2132_v54  ;;  %v2955_v36 = vpop.f32.mrb[15].mxu0 }
0x149c   :  { %3298 = vtanh.f32 %v3160_v55  ;;  %v2581_v59 = vmul.f32 -1.442695, %v3160_v55 }
0x149d   :  { %3300 = vpow2.f32 %v2583_v58 }
0x149e   :  { %3302 = vpow2.f32 %v2581_v59 }
0x14a0   :  { %v3297_v56 = vpop.eup %3296 }
0x14a1   :  { %2247 = vrot.lane.b32.xlu0 %v3297_v56, %s3495_s22 }
0x14a6   :  { %v3299_v57 = vpop.eup %3298 }
0x14a7   :  { %2146 = vrot.lane.b32.xlu1 %v3299_v57, %s3495_s22  ;;  %v3301_v60 = vpop.eup %3300 }
0x14a8   :  { %v2238_v61 = vadd.f32 1.0, %v3301_v60  ;;  %v3303_v62 = vpop.eup %3302 }
0x14a9   :  { %v2140_v15 = vadd.f32 1.0, %v3303_v62 }
0x14aa   :  { %3304 = vrcp.f32 %v2238_v61 }
0x14ab   :  { %3306 = vrcp.f32 %v2140_v15 }
0x14b4   :  { %v3305_v63 = vpop.eup %3304 }
0x14b5   :  { %v3307_v4 = vpop.eup %3306  ;;  %v2245_v9 = vmul.f32 %v3305_v63, %v2243_v7 }
0x14b6   :  { %v2144_v13 = vmul.f32 %v3307_v4, %v3940_v38 }
0x1513   :  { %v2248_v2 = vpop.permute.xlu0 %2247 }
0x1514   :  { %v2250_v3 = vmul.f32 %v3305_v63, %v2248_v2 }
0x1516   :  { %2252 = vrot.lane.b32.xlu0 %v2250_v3, %s3496_s3 }
0x1519   :  { %v2147_v5 = vpop.permute.xlu1 %2146 }
0x151a   :  { %v2149_v6 = vmul.f32 %v3307_v4, %v2147_v5 }
0x151c   :  { %2151 = vrot.lane.b32.xlu1 %v2149_v6, %s3496_s3 }
0x1588   :  { %v2253_v10 = vpop.permute.xlu0 %2252 }
0x1589   :  { %v2255_v11 = vadd.f32 %v2253_v10, %v2245_v9 }
0x158b   :  { %3308 = vtanh.f32 %v2255_v11 }
0x158e   :  { %v2152_v14 = vpop.permute.xlu1 %2151 }
0x158f   :  { %v2154_v16 = vadd.f32 %v2152_v14, %v2144_v13 }
0x1591   :  { %3310 = vtanh.f32 %v2154_v16 }
0x1595   :  { %v3309_v18 = vpop.eup %3308 }
0x1596   :  { %2258 = vrot.lane.b32.xlu0 %v3309_v18, %s3495_s22 }
0x159b   :  { %v3311_v8 = vpop.eup %3310 }
0x159c   :  { %2157 = vrot.lane.b32.xlu1 %v3311_v8, %s3495_s22 }
0x1608   :  { %v2259_v19 = vpop.permute.xlu0 %2258 }
0x1609   :  { %v2261_v12 = vmul.f32 %v3305_v63, %v2259_v19 }
0x160b   :  { %v2263_v20 = vrot.slane %v2261_v12, 6 }
0x160d   :  { %2264 = vrot.lane.b32.xlu0 %v2263_v20, %s3496_s3 }
0x160e   :  { %v2158_v21 = vpop.permute.xlu1 %2157 }
0x160f   :  { %v2160_v22 = vmul.f32 %v3307_v4, %v2158_v21 }
0x1611   :  { %2340 = vrot.lane.b32.xlu1 %v2160_v22, %s3496_s3 }
0x167f   :  { %v2265_v23 = vpop.permute.xlu0 %2264 }
0x1680   :  { %2976 = vmatmul.mubr.msk.f32.vlgmr.msra.gmra.mrb[16].mxu1 %vm227_vm2, %v2265_v23 }
0x1681   :  { %3144 = vmatpush3.bf16.msra.mxu1 %v3705_v42  ;;  %2986 = vmatprep.mubr.msk.f32.mxu1 %vm3493_vm0, %v3494_v1 }
0x1682   :  { %3145 = vmatprep.subr.bf16.mxu1 %v3492_v0 }
0x1683   :  { %v2341_v24 = vpop.permute.xlu1 %2340 }
0x1685   :  { %3147 = vmatpush3.bf16.msra.mxu1 %v3710_v46 }
0x1688   :  { %2987 = vmatmul.mubr.msk.f32.vlgmr.msra.gmra.mrb[16].mxu1 %vm227_vm2, %v2341_v24 }
0x175b   :  { %v2410_v17 = vpop.f32.mrb[16].mxu1 }
0x175c   :  { %v3161_v25 = vadd.f32 %v3734_v51, %v2410_v17  ;;  %v2988_v26 = vpop.f32.mrb[17].mxu1  ;;  %v2439_v51 = vld [vmem:[#allocation11] sm:$0xff] }
0x175d   :  { %v3149_v38 = vpack.c.bf16 %v2440_v35, %v2439_v51 }
0x175e   :  { %3312 = vtanh.f32 %v3161_v25  ;;  %v2586_v28 = vmul.f32 -1.442695, %v3161_v25 }
0x175f   :  { %3150 = vmatpush3.bf16.msra.mxu0 %v3149_v38 }
0x1760   :  { %3314 = vpow2.f32 %v2586_v28  ;;  %3151 = vmatprep.subr.bf16.mxu0 %v3492_v0 }
0x1763   :  { %3153 = vmatpush3.bf16.msra.mxu0 %v3152_v40 }
0x1768   :  { %v3313_v27 = vpop.eup %3312 }
0x1769   :  { %2424 = vrot.lane.b32.xlu0 %v3313_v27, %s3495_s22 }
0x176a   :  { %v3315_v42 = vpop.eup %3314 }
0x176b   :  { %v2418_v29 = vadd.f32 1.0, %v3315_v42 }
0x176d   :  { %3316 = vrcp.f32 %v2418_v29 }
0x1777   :  { %v3317_v1 = vpop.eup %3316 }
0x1778   :  { %v2422_v46 = vmul.f32 %v3317_v1, %v2154_v16 }
0x17db   :  { %v2425_v30 = vpop.permute.xlu0 %2424 }
0x17dc   :  { %v2427_v31 = vmul.f32 %v3317_v1, %v2425_v30 }
0x17de   :  { %2429 = vrot.lane.b32.xlu1 %v2427_v31, %s3496_s3 }
0x1850   :  { %v2430_v32 = vpop.permute.xlu1 %2429 }
0x1851   :  { %v2432_v33 = vadd.f32 %v2430_v32, %v2422_v46 }
0x1853   :  { %3318 = vtanh.f32 %v2432_v33 }
0x185d   :  { %v3319_v41 = vpop.eup %3318 }
0x185e   :  { %2435 = vrot.lane.b32.xlu0 %v3319_v41, %s3495_s22 }
0x18d0   :  { %v2436_v43 = vpop.permute.xlu0 %2435 }
0x18d1   :  { %v2438_v44 = vmul.f32 %v3317_v1, %v2436_v43 }
0x18d3   :  { %2451 = vrot.lane.b32.xlu1 %v2438_v44, %s3496_s3 }
0x1945   :  { %v2452_v45 = vpop.permute.xlu1 %2451 }
0x1946   :  { %2998 = vmatmul.mubr.msk.f32.vlgmr.msra.gmra.mrb[16].mxu0 %vm227_vm2, %v2452_v45 }
0x1a19   :  { %v2521_v48 = vpop.f32.mrb[16].mxu0 }
0x1a1a   :  { %v2522_v0 = vadd.f32 %v2587_v47, %v2521_v48  ;;  %v2999_v49 = vpop.f32.mrb[17].mxu0 }
0x1a1c   :  { %2526 = vst.msk [vmem:[#allocation13] sm:$0x3] %vm2525_vm3, %v2522_v0 }
0x1a1d   :  { %3463 = shalt.err (!%p3460_p10)
}
0x1a1e   :  { %s3464_s4 = scalar_lea.hbm %s4014_s9, 32 }
0x1a1f   :  { %p3465_p11 = scmp.ne.s32.totalorder %s4014_s9, %s3464_s4  ;;  %p3468_p12 = scmp.lt.u32.totalorder %s3464_s4, %s4014_s9 }
0x1a21   :  { %p3470_p13 = pnand %p3468_p12, %p3465_p11 }
0x1a23   :  { %3473 = shalt.err (!%p3470_p13)
}
0x1a24   :  { %2536 = dma.vmem_to_hbm [thread:$0]  %s2534_s23, 32, %s4014_s9, [#allocation4]  }
0x1a25   :  { %3482 = dma.done.wait [#allocation4], 32  }
0x1a26   :  { %3483 = vsyncadd [#allocation4], 4294967264 }
0x1a27   :  { %2540 = vsyncpa [#allocation3], 1 }
0x1a28   :  { %2541 = vsyncpa [#allocation6], 1 }
0x1a29   :  { %2542 = vsyncpa [#allocation9], 1 }
0x1a2a   :  { %2543 = vsyncpa [#allocation12], 1 }
0x1a2b   :  { %2544 = vsyncpa [#allocation4], 1 }

</bundles_post_ra>
